<compile_context>
chip_gen: v5e
topology: v5e:2x2
jax: 0.10.0
libtpu: 0.0.40
codegen_flags: <defaults>
</compile_context>

<pallas_src>
import functools

import jax
import jax.numpy as jnp
import numpy as np
from jax.experimental import pallas as pl
from jax.experimental.pallas import tpu as pltpu


# ----------------------------- Pallas kernel --------------------------------
def sdconv_kernel(qprev_ref, qcur_ref, qnext_ref, dw_ref, pw_ref, pwb_ref,
                  ck_ref, ckb_ref, ap_ref, apb_ref, ones_ref, emat_ref,
                  o_ref, *, ksize, tile_s):
    K = ksize
    pad = (K - 1) // 2
    T = tile_s
    H = qcur_ref.shape[2]
    f32 = jnp.float32
    bf16 = jnp.bfloat16

    i = pl.program_id(1)
    n_i = pl.num_programs(1)
    has_prev = (i > 0).astype(f32)
    has_next = (i < n_i - 1).astype(f32)

    qc = qcur_ref[0]                    # (T, H) bf16, current tile
    qp = qprev_ref[0]                   # (T, H) bf16, previous tile (clamped)
    qn = qnext_ref[0]                   # (T, H) bf16, next tile (clamped)

    qc32 = qc.astype(f32)
    qp32 = qp.astype(f32) * has_prev    # zero the halo at the sequence start
    qn32 = qn.astype(f32) * has_next    # zero the halo at the sequence end

    row = jax.lax.broadcasted_iota(jnp.int32, (T, H), 0)

    def shifted(prev, cur, nxt, off):
        # out[s] = x[tile_start + s + off], zero-padded outside the sequence.
        # Two XLU rolls + one select; no concat, no misaligned slices.
        if off == 0:
            return cur
        sh = (-off) % T
        rc = pltpu.roll(cur, shift=sh, axis=0)
        if off < 0:
            rp = pltpu.roll(prev, shift=sh, axis=0)
            return jnp.where(row >= -off, rc, rp)
        rn = pltpu.roll(nxt, shift=sh, axis=0)
        return jnp.where(row < T - off, rc, rn)

    # 1a. depthwise Conv1d (groups=H, bias=False): K shifted full-lane MACs.
    dw_w = dw_ref[...].astype(f32)                         # (K, H)
    dw_out = jnp.zeros((T, H), f32)
    for k in range(K):
        dw_out = dw_out + shifted(qp32, qc32, qn32, k - pad) * dw_w[k][None, :]

    # 1b. grouped pointwise conv as dense block-diagonal matmul (MXU, bf16->f32).
    key_conv = jnp.dot(dw_out.astype(bf16), pw_ref[...],
                       preferred_element_type=f32) + pwb_ref[...]

    # 2. elementwise gating by the query (stride == 1 path).
    conv_attn = key_conv * qc32

    # 3. grouped 1x1 conv -> per-(pos, head) kernel logits, lane-padded to HKP.
    logits = jnp.dot(conv_attn.astype(bf16), ck_ref[...],
                     preferred_element_type=f32) + ckb_ref[...]   # (T, HKP)

    # 4. softmax over K per head, vectorized across heads: one row max (softmax
    #    is shift-invariant per segment), exp, block-diagonal ones matmul for
    #    the segmented denominator, EUP reciprocal.
    m = jnp.max(logits, axis=-1, keepdims=True)
    e = jnp.exp(logits - m)
    denom = jnp.dot(e.astype(bf16), ones_ref[...], preferred_element_type=f32)
    w = e * pl.reciprocal(denom, approx=True)
    w16 = w.astype(bf16)                                          # (T, HKP)

    # 5. value projection for the current tile and its two halo tiles.
    ap_w = ap_ref[...]
    apb = apb_ref[...]
    vp_c = jnp.dot(qc, ap_w, preferred_element_type=f32) + apb
    vp_p = (jnp.dot(qp, ap_w, preferred_element_type=f32) + apb) * has_prev
    vp_n = (jnp.dot(qn, ap_w, preferred_element_type=f32) + apb) * has_next

    # 6. dynamic (lightweight) conv: expand weights to (T, H) per tap with the
    #    0/1 scatter matrices E_k (MXU) and MAC against shifted value proj.
    acc = jnp.zeros((T, H), f32)
    for k in range(K):
        wk = jnp.dot(w16, emat_ref[k], preferred_element_type=f32)   # (T, H)
        acc = acc + wk * shifted(vp_p, vp_c, vp_n, k - pad)

    o_ref[0] = acc.astype(o_ref.dtype)   # single lane-dense store


# ----------------------------- wrapper ---------------------------------------
def sdconv_pallas(q, params, *, heads, head_size, ksize, tile_s=8):
    B, S, H = q.shape
    K = ksize
    pad = (K - 1) // 2
    HK = heads * K
    HKP = ((HK + 127) // 128) * 128          # lane-pad heads*K to a 128 multiple
    assert heads * head_size == H
    assert S % tile_s == 0 and tile_s % 8 == 0 and tile_s >= pad
    n_s = S // tile_s
    f32, bf16 = jnp.float32, jnp.bfloat16

    # Lane-pad the conv_attn_kernel weights/bias with zero columns.
    ck_pad = np.zeros((H, HKP), np.float32)
    ck_pad[:, :HK] = np.asarray(params["ck"])
    ckb_pad = np.zeros((1, HKP), np.float32)
    ckb_pad[0, :HK] = np.asarray(params["ckb"])

    # Block-diagonal ones for the segmented softmax denominator; identity on the
    # padded tail so reciprocal() never sees a zero.
    ones_blk = np.eye(HKP, dtype=np.float32)
    for h in range(heads):
        ones_blk[h * K:(h + 1) * K, h * K:(h + 1) * K] = 1.0

    # E_k scatter matrices: E[k, h*K + k, h*head_size + d] = 1.
    e_mat = np.zeros((K, HKP, H), np.float32)
    for h in range(heads):
        for k in range(K):
            e_mat[k, h * K + k, h * head_size:(h + 1) * head_size] = 1.0

    q16 = q.astype(bf16)

    # Advisory cost estimate (per-row matmuls + elementwise, halo re-reads).
    mm = (2 * H * H + 2 * H * HKP + 3 * 2 * H * H + 2 * HKP * HKP
          + K * 2 * HKP * H)
    ew = K * 4 * H + 2 * H
    flops = B * S * (mm + ew)
    transcendentals = B * S * 2 * HKP
    bytes_accessed = (3 * B * S * H * 2 + B * S * H * 4
                      + 2 * (2 * H * H + H * HKP + HKP * HKP + K * HKP * H)
                      + 4 * (K * H + 3 * H + HKP))

    kern = functools.partial(sdconv_kernel, ksize=K, tile_s=tile_s)
    wspec = lambda shape: pl.BlockSpec(shape, lambda b, i: (0,) * len(shape))

    return pl.pallas_call(
        kern,
        out_shape=jax.ShapeDtypeStruct((B, S, H), jnp.float32),
        grid=(B, n_s),
        in_specs=[
            # query tile + halo neighbours (clamped at the sequence edges;
            # the kernel masks the clamped halos to zero).
            pl.BlockSpec((1, tile_s, H), lambda b, i: (b, jnp.maximum(i - 1, 0), 0)),
            pl.BlockSpec((1, tile_s, H), lambda b, i: (b, i, 0)),
            pl.BlockSpec((1, tile_s, H),
                         lambda b, i: (b, jnp.minimum(i + 1, n_s - 1), 0)),
            wspec((K, H)),        # depthwise weight (K, H), f32
            wspec((H, H)),        # pointwise block-diag dense, bf16
            wspec((1, H)),        # pointwise bias, f32
            wspec((H, HKP)),      # conv_attn_kernel dense (lane-padded), bf16
            wspec((1, HKP)),      # conv_attn_kernel bias (lane-padded), f32
            wspec((H, H)),        # conv_attn_point W^T, bf16
            wspec((1, H)),        # conv_attn_point bias, f32
            wspec((HKP, HKP)),    # block-diagonal ones (softmax denominator)
            wspec((K, HKP, H)),   # E_k scatter matrices
        ],
        out_specs=pl.BlockSpec((1, tile_s, H), lambda b, i: (b, i, 0)),
        compiler_params=pltpu.CompilerParams(
            dimension_semantics=("parallel", "parallel"),
            vmem_limit_bytes=32 * 1024 * 1024),
        cost_estimate=pl.CostEstimate(flops=flops,
                                      transcendentals=transcendentals,
                                      bytes_accessed=bytes_accessed),
    )(q16, q16, q16,
      params["dw"].astype(f32),
      params["pw"].astype(bf16),
      params["pwb"].reshape(1, -1).astype(f32),
      jnp.asarray(ck_pad).astype(bf16),
      jnp.asarray(ckb_pad),
      params["ap"].astype(bf16),
      params["apb"].reshape(1, -1).astype(f32),
      jnp.asarray(ones_blk).astype(bf16),
      jnp.asarray(e_mat).astype(bf16))


# ----------------------------- parameter setup ------------------------------
def block_diag_from_grouped(w, groups, in_per_group, out_per_group):
    """w: (groups*out_per_group, in_per_group) grouped-conv weight -> dense
    (groups*in_per_group, groups*out_per_group) so y = x @ dense matches
    PyTorch's grouped Conv1d with kernel_size=1."""
    dense = np.zeros((groups * in_per_group, groups * out_per_group), np.float32)
    w = np.asarray(w)
    for g in range(groups):
        blk = w[g * out_per_group:(g + 1) * out_per_group, :]      # (opg, ipg)
        dense[g * in_per_group:(g + 1) * in_per_group,
              g * out_per_group:(g + 1) * out_per_group] = blk.T
    return jnp.asarray(dense)


def make_params(key, hidden, heads, head_size, ksize):
    all_head = heads * head_size
    ks = jax.random.split(key, 8)
    scale = 0.1
    dw = scale * jax.random.normal(ks[0], (hidden, ksize), jnp.float32)
    pw_g = scale * jax.random.normal(ks[1], (all_head, head_size), jnp.float32)
    pwb = scale * jax.random.normal(ks[2], (all_head,), jnp.float32)
    ck_g = scale * jax.random.normal(ks[3], (heads * ksize, head_size), jnp.float32)
    ckb = scale * jax.random.normal(ks[4], (heads * ksize,), jnp.float32)
    ap_w = scale * jax.random.normal(ks[5], (all_head, hidden), jnp.float32)
    apb = scale * jax.random.normal(ks[6], (all_head,), jnp.float32)
    return {
        "dw": dw.T,                                                   # (K, H)
        "pw": block_diag_from_grouped(pw_g, heads, head_size, head_size),
        "pwb": pwb,
        "ck": block_diag_from_grouped(ck_g, heads, head_size, ksize),
        "ckb": ckb,
        "ap": ap_w.T,                                                 # (H, H)
        "apb": apb,
    }


# ----------------------------- pure-JAX reference ---------------------------
def sdconv_ref(q, params, *, heads, head_size, ksize):
    B, S, H = q.shape
    pad = (ksize - 1) // 2
    qp = jnp.pad(q, ((0, 0), (pad, pad), (0, 0)))
    dw_out = sum(qp[:, k:k + S, :] * params["dw"][k] for k in range(ksize))
    key_conv = dw_out @ params["pw"] + params["pwb"]
    conv_attn = key_conv * q
    logits = conv_attn @ params["ck"] + params["ckb"]             # (B, S, heads*K)
    w = jax.nn.softmax(logits.reshape(B, S, heads, ksize), axis=-1)
    vproj = q @ params["ap"] + params["apb"]
    vp = jnp.pad(vproj, ((0, 0), (pad, pad), (0, 0))).reshape(
        B, S + 2 * pad, heads, head_size)
    out = jnp.zeros((B, S, heads, head_size), jnp.float32)
    for k in range(ksize):
        out = out + w[..., k:k + 1] * vp[:, k:k + S]
    return out.reshape(B, S, H)


# --------------------------------- main --------------------------------------
if __name__ == "__main__":
    B, S, hidden = 2, 16, 32
    heads, head_size, ksize = 4, 8, 9        # all_head_size == hidden_size
    tile_s = 8

    key = jax.random.PRNGKey(0)
    kq, kp = jax.random.split(key)
    q = jax.random.normal(kq, (B, S, hidden), jnp.float32)
    params = make_params(kp, hidden, heads, head_size, ksize)

    out = sdconv_pallas(q, params, heads=heads, head_size=head_size,
                        ksize=ksize, tile_s=tile_s)
    out = jax.block_until_ready(out)

    ref = sdconv_ref(q, params, heads=heads, head_size=head_size, ksize=ksize)
    # Kernel feeds the MXU bf16 operands (f32 accumulation); compare loosely
    # against the pure-f32 reference.
    np.testing.assert_allclose(np.asarray(out), np.asarray(ref),
                               rtol=3e-2, atol=3e-2)
    print("KERNEL_OK")
</pallas_src>

<mosaic_0001>
module attributes {stable_mosaic.version = 11 : i64} {
  func.func @sdconv_kernel(%arg0: i32, %arg1: i32, %arg2: memref<1x8x32xbf16, #tpu.memory_space<vmem>>, %arg3: memref<1x8x32xbf16, #tpu.memory_space<vmem>>, %arg4: memref<1x8x32xbf16, #tpu.memory_space<vmem>>, %arg5: memref<9x32xf32, #tpu.memory_space<vmem>>, %arg6: memref<32x32xbf16, #tpu.memory_space<vmem>>, %arg7: memref<1x32xf32, #tpu.memory_space<vmem>>, %arg8: memref<32x128xbf16, #tpu.memory_space<vmem>>, %arg9: memref<1x128xf32, #tpu.memory_space<vmem>>, %arg10: memref<32x32xbf16, #tpu.memory_space<vmem>>, %arg11: memref<1x32xf32, #tpu.memory_space<vmem>>, %arg12: memref<128x128xbf16, #tpu.memory_space<vmem>>, %arg13: memref<9x128x32xbf16, #tpu.memory_space<vmem>>, %arg14: memref<1x8x32xf32, #tpu.memory_space<vmem>>) attributes {dimension_semantics = [#tpu.dimension_semantics<parallel>, #tpu.dimension_semantics<parallel>], iteration_bounds = array<i64: 2, 2>, scalar_prefetch = 0 : i64, scratch_operands = 0 : i64, tpu.core_type = #tpu.core_type<tc>, window_params = [{transform_indices = @transform_0, window_bounds = array<i64: 1, 8, 32>}, {transform_indices = @transform_1, window_bounds = array<i64: 1, 8, 32>}, {transform_indices = @transform_2, window_bounds = array<i64: 1, 8, 32>}, {pipeline_mode = #tpu.pipeline_mode<synchronous>, transform_indices = @transform_3, window_bounds = array<i64: 9, 32>}, {pipeline_mode = #tpu.pipeline_mode<synchronous>, transform_indices = @transform_4, window_bounds = array<i64: 32, 32>}, {pipeline_mode = #tpu.pipeline_mode<synchronous>, transform_indices = @transform_5, window_bounds = array<i64: 1, 32>}, {pipeline_mode = #tpu.pipeline_mode<synchronous>, transform_indices = @transform_6, window_bounds = array<i64: 32, 128>}, {pipeline_mode = #tpu.pipeline_mode<synchronous>, transform_indices = @transform_7, window_bounds = array<i64: 1, 128>}, {pipeline_mode = #tpu.pipeline_mode<synchronous>, transform_indices = @transform_8, window_bounds = array<i64: 32, 32>}, {pipeline_mode = #tpu.pipeline_mode<synchronous>, transform_indices = @transform_9, window_bounds = array<i64: 1, 32>}, {pipeline_mode = #tpu.pipeline_mode<synchronous>, transform_indices = @transform_10, window_bounds = array<i64: 128, 128>}, {pipeline_mode = #tpu.pipeline_mode<synchronous>, transform_indices = @transform_11, window_bounds = array<i64: 9, 128, 32>}, {transform_indices = @transform_12, window_bounds = array<i64: 1, 8, 32>}]} {
    %c0_i32 = arith.constant 0 : i32
    %0 = arith.cmpi sgt, %arg1, %c0_i32 : i32
    %1 = arith.extui %0 : i1 to i32
    %2 = arith.sitofp %1 : i32 to f32
    %c1_i32 = arith.constant 1 : i32
    %3 = arith.cmpi slt, %arg1, %c1_i32 : i32
    %4 = arith.extui %3 : i1 to i32
    %5 = arith.sitofp %4 : i32 to f32
    %c0 = arith.constant 0 : index
    %c0_0 = arith.constant 0 : index
    %c0_1 = arith.constant 0 : index
    %6 = vector.load %arg3[%c0, %c0_0, %c0_1] : memref<1x8x32xbf16, #tpu.memory_space<vmem>>, vector<1x8x32xbf16>
    %7 = vector.shape_cast %6 : vector<1x8x32xbf16> to vector<8x32xbf16>
    %c0_2 = arith.constant 0 : index
    %c0_3 = arith.constant 0 : index
    %c0_4 = arith.constant 0 : index
    %8 = vector.load %arg2[%c0_2, %c0_3, %c0_4] : memref<1x8x32xbf16, #tpu.memory_space<vmem>>, vector<1x8x32xbf16>
    %9 = vector.shape_cast %8 : vector<1x8x32xbf16> to vector<8x32xbf16>
    %c0_5 = arith.constant 0 : index
    %c0_6 = arith.constant 0 : index
    %c0_7 = arith.constant 0 : index
    %10 = vector.load %arg4[%c0_5, %c0_6, %c0_7] : memref<1x8x32xbf16, #tpu.memory_space<vmem>>, vector<1x8x32xbf16>
    %11 = vector.shape_cast %10 : vector<1x8x32xbf16> to vector<8x32xbf16>
    %12 = arith.extf %7 : vector<8x32xbf16> to vector<8x32xf32>
    %13 = arith.extf %9 : vector<8x32xbf16> to vector<8x32xf32>
    %14 = vector.broadcast %2 : f32 to vector<8x32xf32>
    %15 = arith.mulf %13, %14 : vector<8x32xf32>
    %16 = arith.extf %11 : vector<8x32xbf16> to vector<8x32xf32>
    %17 = vector.broadcast %5 : f32 to vector<8x32xf32>
    %18 = arith.mulf %16, %17 : vector<8x32xf32>
    %19 = tpu.iota {dimensions = array<i32: 0>} : vector<8x32xi32>
    %c0_8 = arith.constant 0 : index
    %c0_9 = arith.constant 0 : index
    %20 = vector.load %arg5[%c0_8, %c0_9] : memref<9x32xf32, #tpu.memory_space<vmem>>, vector<9x32xf32>
    %cst = arith.constant 0.000000e+00 : f32
    %21 = vector.broadcast %cst : f32 to vector<8x32xf32>
    %c4_i32 = arith.constant 4 : i32
    %22 = tpu.dynamic_rotate %12 by %c4_i32 dim 0 : vector<8x32xf32>, i32 -> vector<8x32xf32>
    %c4_i32_10 = arith.constant 4 : i32
    %23 = tpu.dynamic_rotate %15 by %c4_i32_10 dim 0 : vector<8x32xf32>, i32 -> vector<8x32xf32>
    %c4_i32_11 = arith.constant 4 : i32
    %24 = vector.broadcast %c4_i32_11 : i32 to vector<8x32xi32>
    %25 = arith.cmpi sge, %19, %24 : vector<8x32xi32>
    %26 = arith.select %25, %22, %23 : vector<8x32xi1>, vector<8x32xf32>
    %27 = vector.extract_strided_slice %20 {offsets = [0, 0], sizes = [1, 32], strides = [1, 1]} : vector<9x32xf32> to vector<1x32xf32>
    %28 = vector.shape_cast %27 : vector<1x32xf32> to vector<32xf32>
    %29 = vector.shape_cast %28 : vector<32xf32> to vector<1x32xf32>
    %30 = vector.broadcast %29 : vector<1x32xf32> to vector<8x32xf32>
    %31 = arith.mulf %26, %30 : vector<8x32xf32>
    %32 = arith.addf %21, %31 : vector<8x32xf32>
    %c3_i32 = arith.constant 3 : i32
    %33 = tpu.dynamic_rotate %12 by %c3_i32 dim 0 : vector<8x32xf32>, i32 -> vector<8x32xf32>
    %c3_i32_12 = arith.constant 3 : i32
    %34 = tpu.dynamic_rotate %15 by %c3_i32_12 dim 0 : vector<8x32xf32>, i32 -> vector<8x32xf32>
    %c3_i32_13 = arith.constant 3 : i32
    %35 = vector.broadcast %c3_i32_13 : i32 to vector<8x32xi32>
    %36 = arith.cmpi sge, %19, %35 : vector<8x32xi32>
    %37 = arith.select %36, %33, %34 : vector<8x32xi1>, vector<8x32xf32>
    %38 = vector.extract_strided_slice %20 {offsets = [1, 0], sizes = [1, 32], strides = [1, 1]} : vector<9x32xf32> to vector<1x32xf32>
    %39 = vector.shape_cast %38 : vector<1x32xf32> to vector<32xf32>
    %40 = vector.shape_cast %39 : vector<32xf32> to vector<1x32xf32>
    %41 = vector.broadcast %40 : vector<1x32xf32> to vector<8x32xf32>
    %42 = arith.mulf %37, %41 : vector<8x32xf32>
    %43 = arith.addf %32, %42 : vector<8x32xf32>
    %c2_i32 = arith.constant 2 : i32
    %44 = tpu.dynamic_rotate %12 by %c2_i32 dim 0 : vector<8x32xf32>, i32 -> vector<8x32xf32>
    %c2_i32_14 = arith.constant 2 : i32
    %45 = tpu.dynamic_rotate %15 by %c2_i32_14 dim 0 : vector<8x32xf32>, i32 -> vector<8x32xf32>
    %c2_i32_15 = arith.constant 2 : i32
    %46 = vector.broadcast %c2_i32_15 : i32 to vector<8x32xi32>
    %47 = arith.cmpi sge, %19, %46 : vector<8x32xi32>
    %48 = arith.select %47, %44, %45 : vector<8x32xi1>, vector<8x32xf32>
    %49 = vector.extract_strided_slice %20 {offsets = [2, 0], sizes = [1, 32], strides = [1, 1]} : vector<9x32xf32> to vector<1x32xf32>
    %50 = vector.shape_cast %49 : vector<1x32xf32> to vector<32xf32>
    %51 = vector.shape_cast %50 : vector<32xf32> to vector<1x32xf32>
    %52 = vector.broadcast %51 : vector<1x32xf32> to vector<8x32xf32>
    %53 = arith.mulf %48, %52 : vector<8x32xf32>
    %54 = arith.addf %43, %53 : vector<8x32xf32>
    %c1_i32_16 = arith.constant 1 : i32
    %55 = tpu.dynamic_rotate %12 by %c1_i32_16 dim 0 : vector<8x32xf32>, i32 -> vector<8x32xf32>
    %c1_i32_17 = arith.constant 1 : i32
    %56 = tpu.dynamic_rotate %15 by %c1_i32_17 dim 0 : vector<8x32xf32>, i32 -> vector<8x32xf32>
    %c1_i32_18 = arith.constant 1 : i32
    %57 = vector.broadcast %c1_i32_18 : i32 to vector<8x32xi32>
    %58 = arith.cmpi sge, %19, %57 : vector<8x32xi32>
    %59 = arith.select %58, %55, %56 : vector<8x32xi1>, vector<8x32xf32>
    %60 = vector.extract_strided_slice %20 {offsets = [3, 0], sizes = [1, 32], strides = [1, 1]} : vector<9x32xf32> to vector<1x32xf32>
    %61 = vector.shape_cast %60 : vector<1x32xf32> to vector<32xf32>
    %62 = vector.shape_cast %61 : vector<32xf32> to vector<1x32xf32>
    %63 = vector.broadcast %62 : vector<1x32xf32> to vector<8x32xf32>
    %64 = arith.mulf %59, %63 : vector<8x32xf32>
    %65 = arith.addf %54, %64 : vector<8x32xf32>
    %66 = vector.extract_strided_slice %20 {offsets = [4, 0], sizes = [1, 32], strides = [1, 1]} : vector<9x32xf32> to vector<1x32xf32>
    %67 = vector.shape_cast %66 : vector<1x32xf32> to vector<32xf32>
    %68 = vector.shape_cast %67 : vector<32xf32> to vector<1x32xf32>
    %69 = vector.broadcast %68 : vector<1x32xf32> to vector<8x32xf32>
    %70 = arith.mulf %12, %69 : vector<8x32xf32>
    %71 = arith.addf %65, %70 : vector<8x32xf32>
    %c7_i32 = arith.constant 7 : i32
    %72 = tpu.dynamic_rotate %12 by %c7_i32 dim 0 : vector<8x32xf32>, i32 -> vector<8x32xf32>
    %c7_i32_19 = arith.constant 7 : i32
    %73 = tpu.dynamic_rotate %18 by %c7_i32_19 dim 0 : vector<8x32xf32>, i32 -> vector<8x32xf32>
    %c7_i32_20 = arith.constant 7 : i32
    %74 = vector.broadcast %c7_i32_20 : i32 to vector<8x32xi32>
    %75 = arith.cmpi slt, %19, %74 : vector<8x32xi32>
    %76 = arith.select %75, %72, %73 : vector<8x32xi1>, vector<8x32xf32>
    %77 = vector.extract_strided_slice %20 {offsets = [5, 0], sizes = [1, 32], strides = [1, 1]} : vector<9x32xf32> to vector<1x32xf32>
    %78 = vector.shape_cast %77 : vector<1x32xf32> to vector<32xf32>
    %79 = vector.shape_cast %78 : vector<32xf32> to vector<1x32xf32>
    %80 = vector.broadcast %79 : vector<1x32xf32> to vector<8x32xf32>
    %81 = arith.mulf %76, %80 : vector<8x32xf32>
    %82 = arith.addf %71, %81 : vector<8x32xf32>
    %c6_i32 = arith.constant 6 : i32
    %83 = tpu.dynamic_rotate %12 by %c6_i32 dim 0 : vector<8x32xf32>, i32 -> vector<8x32xf32>
    %c6_i32_21 = arith.constant 6 : i32
    %84 = tpu.dynamic_rotate %18 by %c6_i32_21 dim 0 : vector<8x32xf32>, i32 -> vector<8x32xf32>
    %c6_i32_22 = arith.constant 6 : i32
    %85 = vector.broadcast %c6_i32_22 : i32 to vector<8x32xi32>
    %86 = arith.cmpi slt, %19, %85 : vector<8x32xi32>
    %87 = arith.select %86, %83, %84 : vector<8x32xi1>, vector<8x32xf32>
    %88 = vector.extract_strided_slice %20 {offsets = [6, 0], sizes = [1, 32], strides = [1, 1]} : vector<9x32xf32> to vector<1x32xf32>
    %89 = vector.shape_cast %88 : vector<1x32xf32> to vector<32xf32>
    %90 = vector.shape_cast %89 : vector<32xf32> to vector<1x32xf32>
    %91 = vector.broadcast %90 : vector<1x32xf32> to vector<8x32xf32>
    %92 = arith.mulf %87, %91 : vector<8x32xf32>
    %93 = arith.addf %82, %92 : vector<8x32xf32>
    %c5_i32 = arith.constant 5 : i32
    %94 = tpu.dynamic_rotate %12 by %c5_i32 dim 0 : vector<8x32xf32>, i32 -> vector<8x32xf32>
    %c5_i32_23 = arith.constant 5 : i32
    %95 = tpu.dynamic_rotate %18 by %c5_i32_23 dim 0 : vector<8x32xf32>, i32 -> vector<8x32xf32>
    %c5_i32_24 = arith.constant 5 : i32
    %96 = vector.broadcast %c5_i32_24 : i32 to vector<8x32xi32>
    %97 = arith.cmpi slt, %19, %96 : vector<8x32xi32>
    %98 = arith.select %97, %94, %95 : vector<8x32xi1>, vector<8x32xf32>
    %99 = vector.extract_strided_slice %20 {offsets = [7, 0], sizes = [1, 32], strides = [1, 1]} : vector<9x32xf32> to vector<1x32xf32>
    %100 = vector.shape_cast %99 : vector<1x32xf32> to vector<32xf32>
    %101 = vector.shape_cast %100 : vector<32xf32> to vector<1x32xf32>
    %102 = vector.broadcast %101 : vector<1x32xf32> to vector<8x32xf32>
    %103 = arith.mulf %98, %102 : vector<8x32xf32>
    %104 = arith.addf %93, %103 : vector<8x32xf32>
    %c4_i32_25 = arith.constant 4 : i32
    %105 = tpu.dynamic_rotate %12 by %c4_i32_25 dim 0 : vector<8x32xf32>, i32 -> vector<8x32xf32>
    %c4_i32_26 = arith.constant 4 : i32
    %106 = tpu.dynamic_rotate %18 by %c4_i32_26 dim 0 : vector<8x32xf32>, i32 -> vector<8x32xf32>
    %c4_i32_27 = arith.constant 4 : i32
    %107 = vector.broadcast %c4_i32_27 : i32 to vector<8x32xi32>
    %108 = arith.cmpi slt, %19, %107 : vector<8x32xi32>
    %109 = arith.select %108, %105, %106 : vector<8x32xi1>, vector<8x32xf32>
    %110 = vector.extract_strided_slice %20 {offsets = [8, 0], sizes = [1, 32], strides = [1, 1]} : vector<9x32xf32> to vector<1x32xf32>
    %111 = vector.shape_cast %110 : vector<1x32xf32> to vector<32xf32>
    %112 = vector.shape_cast %111 : vector<32xf32> to vector<1x32xf32>
    %113 = vector.broadcast %112 : vector<1x32xf32> to vector<8x32xf32>
    %114 = arith.mulf %109, %113 : vector<8x32xf32>
    %115 = arith.addf %104, %114 : vector<8x32xf32>
    %116 = arith.truncf %115 : vector<8x32xf32> to vector<8x32xbf16>
    %c0_28 = arith.constant 0 : index
    %c0_29 = arith.constant 0 : index
    %117 = vector.load %arg6[%c0_28, %c0_29] : memref<32x32xbf16, #tpu.memory_space<vmem>>, vector<32x32xbf16>
    %cst_30 = arith.constant dense<0.000000e+00> : vector<8x32xf32>
    %118 = tpu.matmul %116, %117, %cst_30 {dimension_numbers = #tpu.dot_dimension_numbers<[1], [0], [0], [1], [0, 0, 1, 1], [], []>} : vector<8x32xbf16>, vector<32x32xbf16>, vector<8x32xf32> -> vector<8x32xf32>
    %c0_31 = arith.constant 0 : index
    %c0_32 = arith.constant 0 : index
    %119 = vector.load %arg7[%c0_31, %c0_32] : memref<1x32xf32, #tpu.memory_space<vmem>>, vector<1x32xf32>
    %120 = vector.broadcast %119 : vector<1x32xf32> to vector<8x32xf32>
    %121 = arith.addf %118, %120 : vector<8x32xf32>
    %122 = arith.mulf %121, %12 : vector<8x32xf32>
    %123 = arith.truncf %122 : vector<8x32xf32> to vector<8x32xbf16>
    %c0_33 = arith.constant 0 : index
    %c0_34 = arith.constant 0 : index
    %124 = vector.load %arg8[%c0_33, %c0_34] : memref<32x128xbf16, #tpu.memory_space<vmem>>, vector<32x128xbf16>
    %cst_35 = arith.constant dense<0.000000e+00> : vector<8x128xf32>
    %125 = tpu.matmul %123, %124, %cst_35 {dimension_numbers = #tpu.dot_dimension_numbers<[1], [0], [0], [1], [0, 0, 1, 1], [], []>} : vector<8x32xbf16>, vector<32x128xbf16>, vector<8x128xf32> -> vector<8x128xf32>
    %c0_36 = arith.constant 0 : index
    %c0_37 = arith.constant 0 : index
    %126 = vector.load %arg9[%c0_36, %c0_37] : memref<1x128xf32, #tpu.memory_space<vmem>>, vector<1x128xf32>
    %127 = vector.broadcast %126 : vector<1x128xf32> to vector<8x128xf32>
    %128 = arith.addf %125, %127 : vector<8x128xf32>
    %cst_38 = arith.constant dense<0xFF800000> : vector<8xf32>
    %129 = vector.multi_reduction <maximumf>, %128, %cst_38 [1] : vector<8x128xf32> to vector<8xf32>
    %130 = vector.shape_cast %129 : vector<8xf32> to vector<8x1xf32>
    %131 = vector.broadcast %130 : vector<8x1xf32> to vector<8x128xf32>
    %132 = arith.subf %128, %131 : vector<8x128xf32>
    %133 = math.exp %132 : vector<8x128xf32>
    %134 = arith.truncf %133 : vector<8x128xf32> to vector<8x128xbf16>
    %c0_39 = arith.constant 0 : index
    %c0_40 = arith.constant 0 : index
    %135 = vector.load %arg12[%c0_39, %c0_40] : memref<128x128xbf16, #tpu.memory_space<vmem>>, vector<128x128xbf16>
    %cst_41 = arith.constant dense<0.000000e+00> : vector<8x128xf32>
    %136 = tpu.matmul %134, %135, %cst_41 {dimension_numbers = #tpu.dot_dimension_numbers<[1], [0], [0], [1], [0, 0, 1, 1], [], []>} : vector<8x128xbf16>, vector<128x128xbf16>, vector<8x128xf32> -> vector<8x128xf32>
    %137 = tpu.reciprocal %136 {approx = true} : vector<8x128xf32> -> vector<8x128xf32>
    %138 = arith.mulf %133, %137 : vector<8x128xf32>
    %139 = arith.truncf %138 : vector<8x128xf32> to vector<8x128xbf16>
    %c0_42 = arith.constant 0 : index
    %c0_43 = arith.constant 0 : index
    %140 = vector.load %arg10[%c0_42, %c0_43] : memref<32x32xbf16, #tpu.memory_space<vmem>>, vector<32x32xbf16>
    %c0_44 = arith.constant 0 : index
    %c0_45 = arith.constant 0 : index
    %141 = vector.load %arg11[%c0_44, %c0_45] : memref<1x32xf32, #tpu.memory_space<vmem>>, vector<1x32xf32>
    %cst_46 = arith.constant dense<0.000000e+00> : vector<8x32xf32>
    %142 = tpu.matmul %7, %140, %cst_46 {dimension_numbers = #tpu.dot_dimension_numbers<[1], [0], [0], [1], [0, 0, 1, 1], [], []>} : vector<8x32xbf16>, vector<32x32xbf16>, vector<8x32xf32> -> vector<8x32xf32>
    %143 = vector.broadcast %141 : vector<1x32xf32> to vector<8x32xf32>
    %144 = arith.addf %142, %143 : vector<8x32xf32>
    %cst_47 = arith.constant dense<0.000000e+00> : vector<8x32xf32>
    %145 = tpu.matmul %9, %140, %cst_47 {dimension_numbers = #tpu.dot_dimension_numbers<[1], [0], [0], [1], [0, 0, 1, 1], [], []>} : vector<8x32xbf16>, vector<32x32xbf16>, vector<8x32xf32> -> vector<8x32xf32>
    %146 = vector.broadcast %141 : vector<1x32xf32> to vector<8x32xf32>
    %147 = arith.addf %145, %146 : vector<8x32xf32>
    %148 = vector.broadcast %2 : f32 to vector<8x32xf32>
    %149 = arith.mulf %147, %148 : vector<8x32xf32>
    %cst_48 = arith.constant dense<0.000000e+00> : vector<8x32xf32>
    %150 = tpu.matmul %11, %140, %cst_48 {dimension_numbers = #tpu.dot_dimension_numbers<[1], [0], [0], [1], [0, 0, 1, 1], [], []>} : vector<8x32xbf16>, vector<32x32xbf16>, vector<8x32xf32> -> vector<8x32xf32>
    %151 = vector.broadcast %141 : vector<1x32xf32> to vector<8x32xf32>
    %152 = arith.addf %150, %151 : vector<8x32xf32>
    %153 = vector.broadcast %5 : f32 to vector<8x32xf32>
    %154 = arith.mulf %152, %153 : vector<8x32xf32>
    %cst_49 = arith.constant 0.000000e+00 : f32
    %155 = vector.broadcast %cst_49 : f32 to vector<8x32xf32>
    %c0_50 = arith.constant 0 : index
    %c0_51 = arith.constant 0 : index
    %c0_52 = arith.constant 0 : index
    %156 = vector.load %arg13[%c0_50, %c0_51, %c0_52] : memref<9x128x32xbf16, #tpu.memory_space<vmem>>, vector<1x128x32xbf16>
    %157 = vector.shape_cast %156 : vector<1x128x32xbf16> to vector<128x32xbf16>
    %cst_53 = arith.constant dense<0.000000e+00> : vector<8x32xf32>
    %158 = tpu.matmul %139, %157, %cst_53 {dimension_numbers = #tpu.dot_dimension_numbers<[1], [0], [0], [1], [0, 0, 1, 1], [], []>} : vector<8x128xbf16>, vector<128x32xbf16>, vector<8x32xf32> -> vector<8x32xf32>
    %c4_i32_54 = arith.constant 4 : i32
    %159 = tpu.dynamic_rotate %144 by %c4_i32_54 dim 0 : vector<8x32xf32>, i32 -> vector<8x32xf32>
    %c4_i32_55 = arith.constant 4 : i32
    %160 = tpu.dynamic_rotate %149 by %c4_i32_55 dim 0 : vector<8x32xf32>, i32 -> vector<8x32xf32>
    %c4_i32_56 = arith.constant 4 : i32
    %161 = vector.broadcast %c4_i32_56 : i32 to vector<8x32xi32>
    %162 = arith.cmpi sge, %19, %161 : vector<8x32xi32>
    %163 = arith.select %162, %159, %160 : vector<8x32xi1>, vector<8x32xf32>
    %164 = arith.mulf %158, %163 : vector<8x32xf32>
    %165 = arith.addf %155, %164 : vector<8x32xf32>
    %c1 = arith.constant 1 : index
    %c0_57 = arith.constant 0 : index
    %c0_58 = arith.constant 0 : index
    %166 = vector.load %arg13[%c1, %c0_57, %c0_58] : memref<9x128x32xbf16, #tpu.memory_space<vmem>>, vector<1x128x32xbf16>
    %167 = vector.shape_cast %166 : vector<1x128x32xbf16> to vector<128x32xbf16>
    %cst_59 = arith.constant dense<0.000000e+00> : vector<8x32xf32>
    %168 = tpu.matmul %139, %167, %cst_59 {dimension_numbers = #tpu.dot_dimension_numbers<[1], [0], [0], [1], [0, 0, 1, 1], [], []>} : vector<8x128xbf16>, vector<128x32xbf16>, vector<8x32xf32> -> vector<8x32xf32>
    %c3_i32_60 = arith.constant 3 : i32
    %169 = tpu.dynamic_rotate %144 by %c3_i32_60 dim 0 : vector<8x32xf32>, i32 -> vector<8x32xf32>
    %c3_i32_61 = arith.constant 3 : i32
    %170 = tpu.dynamic_rotate %149 by %c3_i32_61 dim 0 : vector<8x32xf32>, i32 -> vector<8x32xf32>
    %c3_i32_62 = arith.constant 3 : i32
    %171 = vector.broadcast %c3_i32_62 : i32 to vector<8x32xi32>
    %172 = arith.cmpi sge, %19, %171 : vector<8x32xi32>
    %173 = arith.select %172, %169, %170 : vector<8x32xi1>, vector<8x32xf32>
    %174 = arith.mulf %168, %173 : vector<8x32xf32>
    %175 = arith.addf %165, %174 : vector<8x32xf32>
    %c2 = arith.constant 2 : index
    %c0_63 = arith.constant 0 : index
    %c0_64 = arith.constant 0 : index
    %176 = vector.load %arg13[%c2, %c0_63, %c0_64] : memref<9x128x32xbf16, #tpu.memory_space<vmem>>, vector<1x128x32xbf16>
    %177 = vector.shape_cast %176 : vector<1x128x32xbf16> to vector<128x32xbf16>
    %cst_65 = arith.constant dense<0.000000e+00> : vector<8x32xf32>
    %178 = tpu.matmul %139, %177, %cst_65 {dimension_numbers = #tpu.dot_dimension_numbers<[1], [0], [0], [1], [0, 0, 1, 1], [], []>} : vector<8x128xbf16>, vector<128x32xbf16>, vector<8x32xf32> -> vector<8x32xf32>
    %c2_i32_66 = arith.constant 2 : i32
    %179 = tpu.dynamic_rotate %144 by %c2_i32_66 dim 0 : vector<8x32xf32>, i32 -> vector<8x32xf32>
    %c2_i32_67 = arith.constant 2 : i32
    %180 = tpu.dynamic_rotate %149 by %c2_i32_67 dim 0 : vector<8x32xf32>, i32 -> vector<8x32xf32>
    %c2_i32_68 = arith.constant 2 : i32
    %181 = vector.broadcast %c2_i32_68 : i32 to vector<8x32xi32>
    %182 = arith.cmpi sge, %19, %181 : vector<8x32xi32>
    %183 = arith.select %182, %179, %180 : vector<8x32xi1>, vector<8x32xf32>
    %184 = arith.mulf %178, %183 : vector<8x32xf32>
    %185 = arith.addf %175, %184 : vector<8x32xf32>
    %c3 = arith.constant 3 : index
    %c0_69 = arith.constant 0 : index
    %c0_70 = arith.constant 0 : index
    %186 = vector.load %arg13[%c3, %c0_69, %c0_70] : memref<9x128x32xbf16, #tpu.memory_space<vmem>>, vector<1x128x32xbf16>
    %187 = vector.shape_cast %186 : vector<1x128x32xbf16> to vector<128x32xbf16>
    %cst_71 = arith.constant dense<0.000000e+00> : vector<8x32xf32>
    %188 = tpu.matmul %139, %187, %cst_71 {dimension_numbers = #tpu.dot_dimension_numbers<[1], [0], [0], [1], [0, 0, 1, 1], [], []>} : vector<8x128xbf16>, vector<128x32xbf16>, vector<8x32xf32> -> vector<8x32xf32>
    %c1_i32_72 = arith.constant 1 : i32
    %189 = tpu.dynamic_rotate %144 by %c1_i32_72 dim 0 : vector<8x32xf32>, i32 -> vector<8x32xf32>
    %c1_i32_73 = arith.constant 1 : i32
    %190 = tpu.dynamic_rotate %149 by %c1_i32_73 dim 0 : vector<8x32xf32>, i32 -> vector<8x32xf32>
    %c1_i32_74 = arith.constant 1 : i32
    %191 = vector.broadcast %c1_i32_74 : i32 to vector<8x32xi32>
    %192 = arith.cmpi sge, %19, %191 : vector<8x32xi32>
    %193 = arith.select %192, %189, %190 : vector<8x32xi1>, vector<8x32xf32>
    %194 = arith.mulf %188, %193 : vector<8x32xf32>
    %195 = arith.addf %185, %194 : vector<8x32xf32>
    %c4 = arith.constant 4 : index
    %c0_75 = arith.constant 0 : index
    %c0_76 = arith.constant 0 : index
    %196 = vector.load %arg13[%c4, %c0_75, %c0_76] : memref<9x128x32xbf16, #tpu.memory_space<vmem>>, vector<1x128x32xbf16>
    %197 = vector.shape_cast %196 : vector<1x128x32xbf16> to vector<128x32xbf16>
    %cst_77 = arith.constant dense<0.000000e+00> : vector<8x32xf32>
    %198 = tpu.matmul %139, %197, %cst_77 {dimension_numbers = #tpu.dot_dimension_numbers<[1], [0], [0], [1], [0, 0, 1, 1], [], []>} : vector<8x128xbf16>, vector<128x32xbf16>, vector<8x32xf32> -> vector<8x32xf32>
    %199 = arith.mulf %198, %144 : vector<8x32xf32>
    %200 = arith.addf %195, %199 : vector<8x32xf32>
    %c5 = arith.constant 5 : index
    %c0_78 = arith.constant 0 : index
    %c0_79 = arith.constant 0 : index
    %201 = vector.load %arg13[%c5, %c0_78, %c0_79] : memref<9x128x32xbf16, #tpu.memory_space<vmem>>, vector<1x128x32xbf16>
    %202 = vector.shape_cast %201 : vector<1x128x32xbf16> to vector<128x32xbf16>
    %cst_80 = arith.constant dense<0.000000e+00> : vector<8x32xf32>
    %203 = tpu.matmul %139, %202, %cst_80 {dimension_numbers = #tpu.dot_dimension_numbers<[1], [0], [0], [1], [0, 0, 1, 1], [], []>} : vector<8x128xbf16>, vector<128x32xbf16>, vector<8x32xf32> -> vector<8x32xf32>
    %c7_i32_81 = arith.constant 7 : i32
    %204 = tpu.dynamic_rotate %144 by %c7_i32_81 dim 0 : vector<8x32xf32>, i32 -> vector<8x32xf32>
    %c7_i32_82 = arith.constant 7 : i32
    %205 = tpu.dynamic_rotate %154 by %c7_i32_82 dim 0 : vector<8x32xf32>, i32 -> vector<8x32xf32>
    %c7_i32_83 = arith.constant 7 : i32
    %206 = vector.broadcast %c7_i32_83 : i32 to vector<8x32xi32>
    %207 = arith.cmpi slt, %19, %206 : vector<8x32xi32>
    %208 = arith.select %207, %204, %205 : vector<8x32xi1>, vector<8x32xf32>
    %209 = arith.mulf %203, %208 : vector<8x32xf32>
    %210 = arith.addf %200, %209 : vector<8x32xf32>
    %c6 = arith.constant 6 : index
    %c0_84 = arith.constant 0 : index
    %c0_85 = arith.constant 0 : index
    %211 = vector.load %arg13[%c6, %c0_84, %c0_85] : memref<9x128x32xbf16, #tpu.memory_space<vmem>>, vector<1x128x32xbf16>
    %212 = vector.shape_cast %211 : vector<1x128x32xbf16> to vector<128x32xbf16>
    %cst_86 = arith.constant dense<0.000000e+00> : vector<8x32xf32>
    %213 = tpu.matmul %139, %212, %cst_86 {dimension_numbers = #tpu.dot_dimension_numbers<[1], [0], [0], [1], [0, 0, 1, 1], [], []>} : vector<8x128xbf16>, vector<128x32xbf16>, vector<8x32xf32> -> vector<8x32xf32>
    %c6_i32_87 = arith.constant 6 : i32
    %214 = tpu.dynamic_rotate %144 by %c6_i32_87 dim 0 : vector<8x32xf32>, i32 -> vector<8x32xf32>
    %c6_i32_88 = arith.constant 6 : i32
    %215 = tpu.dynamic_rotate %154 by %c6_i32_88 dim 0 : vector<8x32xf32>, i32 -> vector<8x32xf32>
    %c6_i32_89 = arith.constant 6 : i32
    %216 = vector.broadcast %c6_i32_89 : i32 to vector<8x32xi32>
    %217 = arith.cmpi slt, %19, %216 : vector<8x32xi32>
    %218 = arith.select %217, %214, %215 : vector<8x32xi1>, vector<8x32xf32>
    %219 = arith.mulf %213, %218 : vector<8x32xf32>
    %220 = arith.addf %210, %219 : vector<8x32xf32>
    %c7 = arith.constant 7 : index
    %c0_90 = arith.constant 0 : index
    %c0_91 = arith.constant 0 : index
    %221 = vector.load %arg13[%c7, %c0_90, %c0_91] : memref<9x128x32xbf16, #tpu.memory_space<vmem>>, vector<1x128x32xbf16>
    %222 = vector.shape_cast %221 : vector<1x128x32xbf16> to vector<128x32xbf16>
    %cst_92 = arith.constant dense<0.000000e+00> : vector<8x32xf32>
    %223 = tpu.matmul %139, %222, %cst_92 {dimension_numbers = #tpu.dot_dimension_numbers<[1], [0], [0], [1], [0, 0, 1, 1], [], []>} : vector<8x128xbf16>, vector<128x32xbf16>, vector<8x32xf32> -> vector<8x32xf32>
    %c5_i32_93 = arith.constant 5 : i32
    %224 = tpu.dynamic_rotate %144 by %c5_i32_93 dim 0 : vector<8x32xf32>, i32 -> vector<8x32xf32>
    %c5_i32_94 = arith.constant 5 : i32
    %225 = tpu.dynamic_rotate %154 by %c5_i32_94 dim 0 : vector<8x32xf32>, i32 -> vector<8x32xf32>
    %c5_i32_95 = arith.constant 5 : i32
    %226 = vector.broadcast %c5_i32_95 : i32 to vector<8x32xi32>
    %227 = arith.cmpi slt, %19, %226 : vector<8x32xi32>
    %228 = arith.select %227, %224, %225 : vector<8x32xi1>, vector<8x32xf32>
    %229 = arith.mulf %223, %228 : vector<8x32xf32>
    %230 = arith.addf %220, %229 : vector<8x32xf32>
    %c8 = arith.constant 8 : index
    %c0_96 = arith.constant 0 : index
    %c0_97 = arith.constant 0 : index
    %231 = vector.load %arg13[%c8, %c0_96, %c0_97] : memref<9x128x32xbf16, #tpu.memory_space<vmem>>, vector<1x128x32xbf16>
    %232 = vector.shape_cast %231 : vector<1x128x32xbf16> to vector<128x32xbf16>
    %cst_98 = arith.constant dense<0.000000e+00> : vector<8x32xf32>
    %233 = tpu.matmul %139, %232, %cst_98 {dimension_numbers = #tpu.dot_dimension_numbers<[1], [0], [0], [1], [0, 0, 1, 1], [], []>} : vector<8x128xbf16>, vector<128x32xbf16>, vector<8x32xf32> -> vector<8x32xf32>
    %c4_i32_99 = arith.constant 4 : i32
    %234 = tpu.dynamic_rotate %144 by %c4_i32_99 dim 0 : vector<8x32xf32>, i32 -> vector<8x32xf32>
    %c4_i32_100 = arith.constant 4 : i32
    %235 = tpu.dynamic_rotate %154 by %c4_i32_100 dim 0 : vector<8x32xf32>, i32 -> vector<8x32xf32>
    %c4_i32_101 = arith.constant 4 : i32
    %236 = vector.broadcast %c4_i32_101 : i32 to vector<8x32xi32>
    %237 = arith.cmpi slt, %19, %236 : vector<8x32xi32>
    %238 = arith.select %237, %234, %235 : vector<8x32xi1>, vector<8x32xf32>
    %239 = arith.mulf %233, %238 : vector<8x32xf32>
    %240 = arith.addf %230, %239 : vector<8x32xf32>
    %c0_102 = arith.constant 0 : index
    %c0_103 = arith.constant 0 : index
    %c0_104 = arith.constant 0 : index
    %241 = vector.load %arg14[%c0_102, %c0_103, %c0_104] : memref<1x8x32xf32, #tpu.memory_space<vmem>>, vector<1x8x32xf32>
    %242 = vector.shape_cast %241 : vector<1x8x32xf32> to vector<8x32xf32>
    %243 = vector.shape_cast %240 : vector<8x32xf32> to vector<1x8x32xf32>
    tpu.vector_store %arg14[%c0_102, %c0_103, %c0_104], %243 {strides = array<i32>} : memref<1x8x32xf32, #tpu.memory_space<vmem>>, vector<1x8x32xf32>,
    return
  }
  func.func @transform_0(%arg0: i32, %arg1: i32) -> (i32, i32, i32) {
    %c1_i32 = arith.constant 1 : i32
    %0 = arith.subi %arg1, %c1_i32 : i32
    %c0_i32 = arith.constant 0 : i32
    %1 = arith.maxsi %0, %c0_i32 : i32
    %c0_i32_0 = arith.constant 0 : i32
    %c0_i32_1 = arith.constant 0 : i32
    return %arg0, %1, %c0_i32_0 : i32, i32, i32
  }
  func.func @transform_1(%arg0: i32, %arg1: i32) -> (i32, i32, i32) {
    %c0_i32 = arith.constant 0 : i32
    %c0_i32_0 = arith.constant 0 : i32
    return %arg0, %arg1, %c0_i32 : i32, i32, i32
  }
  func.func @transform_2(%arg0: i32, %arg1: i32) -> (i32, i32, i32) {
    %c1_i32 = arith.constant 1 : i32
    %0 = arith.addi %arg1, %c1_i32 : i32
    %c1_i32_0 = arith.constant 1 : i32
    %1 = arith.minsi %0, %c1_i32_0 : i32
    %c0_i32 = arith.constant 0 : i32
    %c0_i32_1 = arith.constant 0 : i32
    return %arg0, %1, %c0_i32 : i32, i32, i32
  }
  func.func @transform_3(%arg0: i32, %arg1: i32) -> (i32, i32) {
    %c0_i32 = arith.constant 0 : i32
    %c0_i32_0 = arith.constant 0 : i32
    %c0_i32_1 = arith.constant 0 : i32
    return %c0_i32, %c0_i32_0 : i32, i32
  }
  func.func @transform_4(%arg0: i32, %arg1: i32) -> (i32, i32) {
    %c0_i32 = arith.constant 0 : i32
    %c0_i32_0 = arith.constant 0 : i32
    %c0_i32_1 = arith.constant 0 : i32
    return %c0_i32, %c0_i32_0 : i32, i32
  }
  func.func @transform_5(%arg0: i32, %arg1: i32) -> (i32, i32) {
    %c0_i32 = arith.constant 0 : i32
    %c0_i32_0 = arith.constant 0 : i32
    %c0_i32_1 = arith.constant 0 : i32
    return %c0_i32, %c0_i32_0 : i32, i32
  }
  func.func @transform_6(%arg0: i32, %arg1: i32) -> (i32, i32) {
    %c0_i32 = arith.constant 0 : i32
    %c0_i32_0 = arith.constant 0 : i32
    %c0_i32_1 = arith.constant 0 : i32
    return %c0_i32, %c0_i32_0 : i32, i32
  }
  func.func @transform_7(%arg0: i32, %arg1: i32) -> (i32, i32) {
    %c0_i32 = arith.constant 0 : i32
    %c0_i32_0 = arith.constant 0 : i32
    %c0_i32_1 = arith.constant 0 : i32
    return %c0_i32, %c0_i32_0 : i32, i32
  }
  func.func @transform_8(%arg0: i32, %arg1: i32) -> (i32, i32) {
    %c0_i32 = arith.constant 0 : i32
    %c0_i32_0 = arith.constant 0 : i32
    %c0_i32_1 = arith.constant 0 : i32
    return %c0_i32, %c0_i32_0 : i32, i32
  }
  func.func @transform_9(%arg0: i32, %arg1: i32) -> (i32, i32) {
    %c0_i32 = arith.constant 0 : i32
    %c0_i32_0 = arith.constant 0 : i32
    %c0_i32_1 = arith.constant 0 : i32
    return %c0_i32, %c0_i32_0 : i32, i32
  }
  func.func @transform_10(%arg0: i32, %arg1: i32) -> (i32, i32) {
    %c0_i32 = arith.constant 0 : i32
    %c0_i32_0 = arith.constant 0 : i32
    %c0_i32_1 = arith.constant 0 : i32
    return %c0_i32, %c0_i32_0 : i32, i32
  }
  func.func @transform_11(%arg0: i32, %arg1: i32) -> (i32, i32, i32) {
    %c0_i32 = arith.constant 0 : i32
    %c0_i32_0 = arith.constant 0 : i32
    %c0_i32_1 = arith.constant 0 : i32
    %c0_i32_2 = arith.constant 0 : i32
    return %c0_i32, %c0_i32_0, %c0_i32_1 : i32, i32, i32
  }
  func.func @transform_12(%arg0: i32, %arg1: i32) -> (i32, i32, i32) {
    %c0_i32 = arith.constant 0 : i32
    %c0_i32_0 = arith.constant 0 : i32
    return %arg0, %arg1, %c0_i32 : i32, i32, i32
  }
}

</mosaic_0001>

<bundles_post_ra>
// kernel: tpu_custom_call.1
= control target key start
LH: loop header
LB: loop body
LE: loop exit
PB: predicated region body
PF: predicated region fallthrough
CT: control target
= control target key end

     0   :  { %s3062_s0 = inlined_call_operand.vmem [shape: bf16[2,16,32], index: 0, kind: input, shape index: {}]   ;;  %s3063_s1 = inlined_call_operand.vmem [shape: bf16[2,16,32], index: 1, kind: input, shape index: {}]   ;;  %s3064_s2 = inlined_call_operand.vmem [shape: bf16[2,16,32], index: 2, kind: input, shape index: {}]   ;;  %s3065_s3 = inlined_call_operand.vmem [shape: f32[9,32], index: 3, kind: input, shape index: {}]   ;;  %s3066_s4 = inlined_call_operand.vmem [shape: bf16[32,32], index: 4, kind: input, shape index: {}]   ;;  %s3067_s5 = inlined_call_operand.vmem [shape: f32[1,32], index: 5, kind: input, shape index: {}]   ;;  %s3068_s6 = inlined_call_operand.vmem [shape: bf16[32,128], index: 6, kind: input, shape index: {}]   ;;  %s3069_s7 = inlined_call_operand.vmem [shape: f32[1,128], index: 7, kind: input, shape index: {}]   ;;  %s3070_s8 = inlined_call_operand.vmem [shape: bf16[32,32], index: 8, kind: input, shape index: {}]   ;;  %s3071_s9 = inlined_call_operand.vmem [shape: f32[1,32], index: 9, kind: input, shape index: {}]   ;;  %s3072_s10 = inlined_call_operand.vmem [shape: bf16[128,128], index: 10, kind: input, shape index: {}]   ;;  %s3073_s11 = inlined_call_operand.vmem [shape: bf16[9,128,32], index: 11, kind: input, shape index: {}]   ;;  %s3074_s12 = inlined_call_operand.hbm [shape: f32[2,16,32], index: 12, kind: output, shape index: {}]  }
   0x1   :  { %3084 = sst [smem:[#allocation14_spill]] %s3066_s4 }
   0x2   :  { %17 = vsyncpa [#allocation3], 0 }
   0x3   :  { %19 = vsyncpa [#allocation3 + $0x1], 0  ;;  %s2560_s21 = smov 0   ;;  %s2562_s22 = smov 0  }
   0x4   :  { %s2564_s23 = smov 0   ;;  %s2566_s24 = smov 0  }
   0x5   :  { %s2568_s25 = smov 0   ;;  %s2570_s26 = smov 0  }
   0x6   :  { %s2572_s27 = smov 0   ;;  %s2574_s28 = smov 0  }
   0x7 LB: > { %3085 = sst [smem:[#allocation5_spill]] %s2465_s21  ;;  %s1727_s29 = sadd.s32 4294967295, %s2493_s28   ;;  %s2493_s28 = sphi %s2574_s28, %s25_s28   ;;  %s2489_s27 = sphi %s2572_s27, %s3105_s27   ;;  %s2485_s26 = sphi %s2570_s26, %s3104_s26   ;;  %s2481_s25 = sphi %s2568_s25, %s3103_s25   ;;  %s2477_s24 = sphi %s2566_s24, %s3102_s24   ;;  %s2473_s23 = sphi %s2564_s23, %s3101_s23   ;;  %s2469_s22 = sphi %s2562_s22, %s3107_s22   ;;  %s2465_s21 = sphi %s2560_s21, %s3106_s21  }
   0x8   : > { %3086 = sst [smem:[#allocation6_spill]] %s2473_s23  ;;  %s1728_s30 = sadd.s32 4294967294, %s2493_s28  }
   0x9   : > { %3087 = sst [smem:[#allocation7_spill]] %s2485_s26  ;;  %s34_s13 = sadd.s32 1, %s2485_s26 }
   0xa   : > { %3088 = sst [smem:[#allocation8_spill]] %s2489_s27  ;;  %p35_p0 = scmp.ge.s32.totalorder %s34_s13, 2 }
   0xb   : > { %3089 = sst [smem:[#allocation9_spill]] %s2493_s28  ;;  %s37_s14 = sadd.s32 1, %s2489_s27 }
   0xc   : > { %p341_p1 = scmp.ne.s32.totalorder %s2473_s23, %s2469_s22  ;;  %p342_p2 = scmp.eq.s32.totalorder %s1727_s29, 3 }
   0xd   : > { %s3109_s13 = smov (%p35_p0, %s34_s13), 0  ;;  %s3111_s14 = smov (!%p35_p0, %s37_s14), %s2489_s27 }
   0xe   : > { %3090 = sst [smem:[#allocation10_spill]] %s3109_s13  ;;  %s327_s15 = ssub.s32 %s2485_s26, %s3109_s13 }
   0xf   : > { %p2611_p3 = por %p342_p2, %p341_p1  ;;  %p39_p4 = scmp.ge.s32.totalorder %s3111_s14, 2 }
  0x10   : > { %p347_p5 = scmp.ne.s32.totalorder %s2469_s22, %s2465_s21  ;;  %p348_p6 = scmp.eq.s32.totalorder %s1728_s30, 3 }
  0x11   : > { %p1733_p7 = scmp.ge.s32.totalorder %s2493_s28, 1  ;;  %s3113_s14 = smov (%p39_p4, %s3111_s14), 0 }
  0x12   : > { %3092 = sst [smem:[#allocation11_spill]] %s3113_s14  ;;  %p2620_p8 = por %p348_p6, %p347_p5 }
  0x13   : > { %p438_p9 = scmp.lt.s32.totalorder %s2493_s28, 5  ;;  %s326_s18 = ssub.s32 %s2489_s27, %s3113_s14 }
  0x14   : > { %s3093_s17 = scalar_select %p2620_p8, 1, 0 }
  0x15   : > { %s331_s19 = sadd.s32 1, %s2473_s23  ;;  %s328_s20 = sor.u32 %s327_s15, %s326_s18 }
  0x16   : > { %3094 = sst [smem:[#allocation12_spill]] %s3093_s17  ;;  %p439_p10 = pnand %p1733_p7, %p438_p9 }
  0x17   : > { %p329_p11 = scmp.eq.s32.totalorder %s328_s20, 0  ;;  %s3096_s4 = sld [smem:[#allocation14_spill]] (!%p439_p10) }
  0x18   : > { %442 = sbr.rel (%p439_p10) target bundleno = 772 (0x304), region = 68  ;;  %s1735_s30 = sadd.s32 (!%p439_p10), 4294967295, %s2477_s24 }
  0x19   : > { %s2629_s29 = scalar_select %p329_p11, %s2473_s23, %s331_s19  }
  0x1a   : > { %p508_p12 = scmp.lt.s32.totalorder (!%p439_p10), %s2481_s25, 1  ;;  %p506_p13 = scmp.gt.s32.totalorder (!%p439_p10), %s1735_s30, 0 }
  0x1b   : > { %3095 = sst [smem:[#allocation13_spill]] %s2629_s29  ;;  %p1736_p0 = scmp.lt.s32.totalorder (!%p439_p10), %s1735_s30, 1 }
  0x1c   : > { %p521_p1 = scmp.lt.s32.totalorder (!%p439_p10), %s2477_s24, 1  ;;  %s527_s14 = sadd.s32 (!%p439_p10), 1, %s2477_s24 }
  0x1d   : > { %v2235_v0 = vld [vmem:[%s3096_s4 + $0x8] sm:$0xff]  ;;  %v2234_v1 = vld [vmem:[%s3096_s4] sm:$0xff]  ;;  %s509_s19 = scalar_select %p508_p12, %s2481_s25, 1  ;;  %v558_v2 = vlaneseq  ;;  %vm641_vm8 = vcmask 261120  }
  0x1e   : > { %651 = vmatpush.bf16.msra.mxu0 %v2235_v0  ;;  %s3115_s30 = smov (!%p506_p13, %s1735_s30), 0  ;;  %p528_p2 = scmp.lt.s32.totalorder %s527_s14, 1  ;;  %v2661_v6 = vld [vmem:[%s3065_s3] sm:$0xff]  ;;  %v2391_v56 = vld [vmem:[%s3065_s3 + $0x8] ss:$0 sm:$0xff] }
  0x1f   : > { %s1741_s26 = sshll.u32 %s509_s19, 1  ;;  %s3117_s30 = smov (!%p1736_p0, %s3115_s30), 1  ;;  %v2656_v5 = vshrl.u32 %v558_v2, 7  ;;  %v566_v9 = vperm.slane %v2661_v6, 0  ;;  %v573_v10 = vperm.slane %v2661_v6, 1  ;;  %v580_v12 = vperm.slane %v2661_v6, 2 }
  0x20   : > { %s522_s13 = scalar_select %p521_p1, %s2477_s24, 1  ;;  %v587_v24 = vperm.slane %v2661_v6, 3  ;;  %v590_v25 = vperm.slane %v2661_v6, 4  ;;  %v597_v29 = vperm.slane %v2661_v6, 5  ;;  %v604_v46 = vperm.slane %v2661_v6, 6  ;;  %v2236_v2 = vld [vmem:[%s3068_s6] sm:$0xff] }
  0x21   : > { %s513_s20 = sadd.s32 %s3117_s30, %s1741_s26  ;;  %p542_p4 = scmp.gt.s32.totalorder %s2477_s24, 0  ;;  %vm564_vm0 = vcmp.ge.s32.totalorder %v2656_v5, 4  ;;  %vm571_vm1 = vcmp.ge.s32.totalorder %v2656_v5, 3  ;;  %vm578_vm2 = vcmp.ge.s32.totalorder %v2656_v5, 2  ;;  %vm585_vm3 = vcmp.ge.s32.totalorder %v2656_v5, 1 }
  0x22   : > { %652 = vmatpush.bf16.msra.mxu0 %v2234_v1  ;;  %s1742_s27 = sshll.u32 %s513_s20, 2  ;;  %s524_s29 = sadd.s32 %s1741_s26, %s522_s13  ;;  %vm595_vm4 = vcmp.lt.s32.totalorder %v2656_v5, 7  ;;  %vm602_vm5 = vcmp.lt.s32.totalorder %v2656_v5, 6  ;;  %vm609_vm6 = vcmp.lt.s32.totalorder %v2656_v5, 5  ;;  %v611_v52 = vperm.slane %v2661_v6, 7  ;;  %v2237_v1 = vld [vmem:[%s3068_s6 + $0x8] sm:$0xff] }
  0x23   : > { %s515_s21 = scalar_lea.vmem %s3062_s0, %s1742_s27  ;;  %s1744_s28 = sshll.u32 %s524_s29, 2  ;;  %vm615_vm7 = vcmp.lt.s32.totalorder %v2656_v5, 4  ;;  %689 = vmatpush.bf16.msra.mxu1 %v2237_v1  ;;  %v2392_v6 = vld [vmem:[%s3067_s5] ss:$0 sm:$0xff]  ;;  %v2295_v1 = vld [vmem:[%s3073_s11 + $0x178] sm:$0xff] }
  0x24   : > { %s526_s4 = scalar_lea.vmem %s3063_s1, %s1744_s28  ;;  %v2654_v4 = vld [vmem:[%s515_s21] sm:$0xf]  ;;  %s3119_s14 = smov (!%p528_p2, %s527_s14), 1 }
  0x25   : > { %v2652_v3 = vld [vmem:[%s526_s4] sm:$0xf]  ;;  %s543_s30 = scalar_select %p542_p4, 1, 0  ;;  %v552_v8 = vunpack.c.l.bf16 %v2654_v4 }
  0x26   : > { %s3121_s14 = smov (!%p528_p2, %s3119_s14), 1  ;;  %v2664_v7 = vunpack.c.l.bf16 %v2652_v3  ;;  %s2228_s28 = sshll.u32 %s2481_s25, 1 }
  0x27   : > { %s544_s4 = scvt.s32.f32 %s543_s30  ;;  %s535_s23 = sadd.s32 %s1741_s26, %s3121_s14  ;;  %690 = vmatpush.bf16.msra.mxu1 %v2236_v2  ;;  %v2303_v2 = vld [vmem:[%s3073_s11 + $0x1b8] sm:$0xff] }
  0x28   : > { %s1749_s21 = sshll.u32 %s535_s23, 2  ;;  %v562_v14 = vrot.slane %v2664_v7, 4  ;;  %v569_v15 = vrot.slane %v2664_v7, 5  ;;  %v576_v16 = vrot.slane %v2664_v7, 6  ;;  %v583_v18 = vrot.slane %v2664_v7, 7  ;;  %s2419_s27 = scalar_lea.hbm %s3074_s12, 32 }
  0x29   : > { %v2669_v11 = vstv %s544_s4  ;;  %s537_s17 = scalar_lea.vmem %s3064_s2, %s1749_s21  ;;  %v593_v36 = vrot.slane %v2664_v7, 1  ;;  %v600_v37 = vrot.slane %v2664_v7, 2  ;;  %v607_v42 = vrot.slane %v2664_v7, 3 }
  0x2a   : > { %v554_v13 = vmul.f32 %v2669_v11, %v552_v8  ;;  %s546_s14 = scalar_select %p521_p1, 1, 0  ;;  %v2683_v17 = vld [vmem:[%s537_s17] sm:$0xf]  ;;  %v591_v45 = vmul.f32 %v590_v25, %v2664_v7 }
  0x2b   : > { %v555_v19 = vunpack.c.l.bf16 %v2683_v17  ;;  %v2238_v25 = vld [vmem:[%s3072_s10] sm:$0xff]  ;;  %s502_s17 = sand.u32 1, %s2469_s22  }
  0x2c   : > { %v563_v20 = vrot.slane %v554_v13, 4  ;;  %v570_v21 = vrot.slane %v554_v13, 5  ;;  %v577_v22 = vrot.slane %v554_v13, 6  ;;  %s547_s29 = scvt.s32.f32 %s546_s14  ;;  %v584_v23 = vrot.slane %v554_v13, 7  ;;  %s1606_s14 = sadd.s32 %s2477_s24, %s2228_s28 }
  0x2d   : > { %s2229_s26 = sshll.u32 %s1606_s14, 3  ;;  %s1596_s24 = scalar_lea.sflag [#allocation3], %s502_s17 }
  0x2e   : > { %v565_v26 = vsel %vm564_vm0, %v562_v14, %v563_v20  ;;  %v572_v27 = vsel %vm571_vm1, %v569_v15, %v570_v21  ;;  %v579_v28 = vsel %vm578_vm2, %v576_v16, %v577_v22  ;;  %v2698_v30 = vstv %s547_s29  ;;  %v2244_v15 = vld [vmem:[%s3072_s10 + $0x30] sm:$0xff]  ;;  %v2243_v16 = vld [vmem:[%s3072_s10 + $0x28] sm:$0xff]  ;;  %s1734_s29 = sshll.u32 %s502_s17, 3  ;;  %s1608_s18 = scalar_lea.hbm %s3074_s12, %s2229_s26 }
  0x2f   : > { %v567_v31 = vmul.f32 %v566_v9, %v565_v26  ;;  %v574_v32 = vmul.f32 %v573_v10, %v572_v27  ;;  %v581_v33 = vmul.f32 %v580_v12, %v579_v28  ;;  %v557_v34 = vmul.f32 %v2698_v30, %v555_v19  ;;  %v2393_v19 = vld [vmem:[%s3069_s7] ss:$0 sm:$0xff]  ;;  %v2247_v26 = vld [vmem:[%s3070_s8 + $0x8] sm:$0xff]  ;;  %v2279_v28 = vld [vmem:[%s3073_s11 + $0xf8] sm:$0xff]  ;;  %s504_s30 = scalar_lea.vmem [#allocation2], %s1734_s29  ;;  %s1612_s13 = sshll.u32 %s1608_s18, 4  ;;  %s1613_s13 = int_to_ptr.hbm [resolvable:$true] %s1612_s13 }
  0x30   : > { %v586_v35 = vsel %vm585_vm3, %v583_v18, %v584_v23  ;;  %v2241_v18 = vld [vmem:[%s3072_s10 + $0x18] sm:$0xff]  ;;  %v2240_v23 = vld [vmem:[%s3072_s10 + $0x10] sm:$0xff]  ;;  %811 = vmatpush.bf16.msra.mxu3 %v2247_v26  ;;  %v2246_v27 = vld [vmem:[%s3070_s8] sm:$0xff]  ;;  %827 = vmatpush.bf16.msrb.mxu0 %v2247_v26  ;;  %s1610_s19 = sshll.u32 %s504_s30, 4  ;;  %s2413_s25 = sshra.s32 %s1613_s13, 4  ;;  %s1611_s19 = int_to_ptr.vmem [resolvable:$true] %s1610_s19  ;;  %s2414_s25 = int_to_ptr.hbm [resolvable:$true] %s2413_s25 }
  0x31   : > { %v575_v38 = vadd.f32 %v574_v32, %v567_v31  ;;  %v588_v39 = vmul.f32 %v587_v24, %v586_v35  ;;  %v594_v40 = vrot.slane %v557_v34, 1  ;;  %v601_v41 = vrot.slane %v557_v34, 2  ;;  %v2239_v24 = vld [vmem:[%s3072_s10 + $0x8] sm:$0xff]  ;;  %844 = vmatpush.bf16.msrb.mxu1 %v2247_v26  ;;  %v2263_v31 = vld [vmem:[%s3073_s11 + $0x78] sm:$0xff]  ;;  %v2262_v35 = vld [vmem:[%s3073_s11 + $0x70] sm:$0xff]  ;;  %s2415_s4 = scalar_lea.hbm %s2414_s25, 8  ;;  %p2420_p9 = scmp.lt.s32.totalorder %s2414_s25, %s3074_s12 }
  0x32   : > { %v608_v43 = vrot.slane %v557_v34, 3  ;;  %v614_v49 = vrot.slane %v557_v34, 4  ;;  %v2271_v32 = vld [vmem:[%s3073_s11 + $0xb8] sm:$0xff]  ;;  %v2254_v34 = vld [vmem:[%s3073_s11 + $0x30] sm:$0xff]  ;;  %p2416_p5 = scmp.ne.s32.totalorder %s2414_s25, %s2415_s4  ;;  %p2421_p10 = scmp.lt.s32.totalorder %s2419_s27, %s2415_s4 }
  0x33   : > { %v582_v44 = vadd.f32 %v581_v33, %v575_v38  ;;  %v596_v47 = vsel %vm595_vm4, %v593_v36, %v594_v40  ;;  %v603_v48 = vsel %vm602_vm5, %v600_v37, %v601_v41  ;;  %v2278_v33 = vld [vmem:[%s3073_s11 + $0xf0] sm:$0xff]  ;;  %v2277_v37 = vld [vmem:[%s3073_s11 + $0xe8] sm:$0xff]  ;;  %v2260_v40 = vld [vmem:[%s3073_s11 + $0x60] sm:$0xff] }
  0x34   : > { %v598_v51 = vmul.f32 %v597_v29, %v596_v47  ;;  %v610_v53 = vsel %vm609_vm6, %v607_v42, %v608_v43  ;;  %v605_v55 = vmul.f32 %v604_v46, %v603_v48  ;;  %v616_v57 = vsel %vm615_vm7, %v562_v14, %v614_v49  ;;  %v2245_v14 = vld [vmem:[%s3072_s10 + $0x38] sm:$0xff]  ;;  %812 = vmatpush.bf16.msra.mxu3 %v2246_v27  ;;  %v2270_v36 = vld [vmem:[%s3073_s11 + $0xb0] sm:$0xff]  ;;  %v2253_v38 = vld [vmem:[%s3073_s11 + $0x28] sm:$0xff]  ;;  %p2417_p6 = pnand %p2416_p5, %p2611_p3  ;;  %p2422_p11 = por %p2421_p10, %p2420_p9 }
  0x35   : > { %v589_v50 = vadd.f32 %v588_v39, %v582_v44  ;;  %v612_v59 = vmul.f32 %v611_v52, %v610_v53  ;;  %v618_v61 = vmul.f32 %v2391_v56, %v616_v57  ;;  %766 = vmatpush.bf16.msra.mxu2 %v2245_v14  ;;  %v2255_v29 = vld [vmem:[%s3073_s11 + $0x38] sm:$0xff]  ;;  %828 = vmatpush.bf16.msrb.mxu0 %v2246_v27  ;;  %v2269_v39 = vld [vmem:[%s3073_s11 + $0xa8] sm:$0xff]  ;;  %v2268_v41 = vld [vmem:[%s3073_s11 + $0xa0] sm:$0xff] }
  0x36   : > { %845 = vmatpush.bf16.msrb.mxu1 %v2246_v27  ;;  %v2275_v42 = vld [vmem:[%s3073_s11 + $0xd8] sm:$0xff]  ;;  %v2274_v49 = vld [vmem:[%s3073_s11 + $0xd0] sm:$0xff]  ;;  %v2273_v53 = vld [vmem:[%s3073_s11 + $0xc8] sm:$0xff]  ;;  %p2418_p7 = pneg %p2417_p6 }
  0x37   : > { %v592_v54 = vadd.f32 %v591_v45, %v589_v50  ;;  %1808 = vmatmul.msk.bf16.vlgmr.msra.gmra.mxu3 %vm641_vm8, %v2652_v3  ;;  %v2261_v3 = vld [vmem:[%s3073_s11 + $0x68] sm:$0xff]  ;;  %v2251_v45 = vld [vmem:[%s3073_s11 + $0x18] sm:$0xff]  ;;  %v2250_v50 = vld [vmem:[%s3073_s11 + $0x10] sm:$0xff] }
  0x38   : > { %916 = vmatpush.bf16.msrb.mxu3 %v2255_v29  ;;  %v2259_v46 = vld [vmem:[%s3073_s11 + $0x58] sm:$0xff]  ;;  %v2266_v52 = vld [vmem:[%s3073_s11 + $0x90] sm:$0xff]  ;;  %v2265_v57 = vld [vmem:[%s3073_s11 + $0x88] sm:$0xff]  ;;  %p2423_p12 = pnand %p2422_p11, %p2418_p7 }
  0x39   : > { %v599_v58 = vadd.f32 %v598_v51, %v592_v54  ;;  %767 = vmatpush.bf16.msra.mxu2 %v2244_v15  ;;  %v2267_v47 = vld [vmem:[%s3073_s11 + $0x98] sm:$0xff]  ;;  %v2258_v51 = vld [vmem:[%s3073_s11 + $0x50] sm:$0xff]  ;;  %v2249_v54 = vld [vmem:[%s3073_s11 + $0x8] sm:$0xff] }
  0x3a   : > { %v2310_v14 = vld [vmem:[%s3073_s11 + $0x1f0] sm:$0xff]  ;;  %v2307_v26 = vld [vmem:[%s3073_s11 + $0x1d8] sm:$0xff] }
  0x3b   : > { %v606_v60 = vadd.f32 %v605_v55, %v599_v58  ;;  %v2257_v55 = vld [vmem:[%s3073_s11 + $0x48] sm:$0xff]  ;;  %v2272_v58 = vld [vmem:[%s3073_s11 + $0xc0] sm:$0xff]  ;;  %v2282_v15 = vld [vmem:[%s3073_s11 + $0x110] sm:$0xff] }
  0x3c   : > { %917 = vmatpush.bf16.msrb.mxu3 %v2254_v34  ;;  %v2290_v27 = vld [vmem:[%s3073_s11 + $0x150] sm:$0xff]  ;;  %v2288_v34 = vld [vmem:[%s3073_s11 + $0x140] sm:$0xff] }
  0x3d   : > { %v613_v62 = vadd.f32 %v612_v59, %v606_v60  ;;  %768 = vmatpush.bf16.msra.mxu2 %v2243_v16  ;;  %v2311_v60 = vld [vmem:[%s3073_s11 + $0x1f8] sm:$0xff]  ;;  %v2293_v16 = vld [vmem:[%s3073_s11 + $0x168] sm:$0xff]  ;;  %v2306_v29 = vld [vmem:[%s3073_s11 + $0x1d0] sm:$0xff] }
  0x3f   : > { %v619_v63 = vadd.f32 %v618_v61, %v613_v62  ;;  %v2248_v61 = vld [vmem:[%s3073_s11] sm:$0xff]  ;;  %v2287_v62 = vld [vmem:[%s3073_s11 + $0x138] sm:$0xff] }
  0x40   : > { %918 = vmatpush.bf16.msrb.mxu3 %v2253_v38 }
  0x41   : > { %v620_v0 = vpack.c.bf16 %v619_v63, %v619_v63  ;;  %v2256_v63 = vld [vmem:[%s3073_s11 + $0x40] sm:$0xff] }
  0x43   : > { %1758 = vmatmul.msk.bf16.vlgmr.msra.gmra.mxu0 %vm641_vm8, %v620_v0  ;;  %v2264_v0 = vld [vmem:[%s3073_s11 + $0x80] sm:$0xff] }
  0x44   : > { %999 = vmatpush.bf16.msra.mxu0 %v2263_v31  ;;  %v2289_v31 = vld [vmem:[%s3073_s11 + $0x148] sm:$0xff] }
  0x48   : > { %1000 = vmatpush.bf16.msra.mxu0 %v2262_v35  ;;  %v2296_v35 = vld [vmem:[%s3073_s11 + $0x180] sm:$0xff] }
  0x4c   : > { %1001 = vmatpush.bf16.msra.mxu0 %v2261_v3 }
  0x50   : > { %1002 = vmatpush.bf16.msra.mxu0 %v2260_v40 }
  0x53   : > { %1809 = vmatmul.msk.bf16.vlgmr.msrb.gmra.mxu0 %vm641_vm8, %v2654_v4  ;;  %v2276_v4 = vld [vmem:[%s3073_s11 + $0xe0] sm:$0xff] }
  0x54   : > { %1003 = vmatpush.bf16.msra.mxu0 %v2259_v46 }
  0x58   : > { %1004 = vmatpush.bf16.msra.mxu0 %v2258_v51  ;;  %v2313_v51 = vld [vmem:[%s3073_s11 + $0x208] sm:$0xff] }
  0x5c   : > { %1005 = vmatpush.bf16.msra.mxu0 %v2257_v55 }
  0x60   : > { %1006 = vmatpush.bf16.msra.mxu0 %v2256_v63 }
  0x64   : > { %1328 = vmatpush.bf16.msrb.mxu0 %v2295_v1 }
  0xba   : > { %v814_v40 = vpop.f32.mrf.mxu3 }
  0xc0   : > { %v654_v8 = vpop.f32.mrf.mxu0 }
  0xc1   : > { %v655_v9 = vadd.f32 %v2392_v6, %v654_v8  ;;  %v2286_v6 = vld [vmem:[%s3073_s11 + $0x130] sm:$0xff]  ;;  %v2285_v8 = vld [vmem:[%s3073_s11 + $0x128] sm:$0xff] }
  0xc3   : > { %v658_v10 = vmul.f32 %v655_v9, %v2664_v7  ;;  %v2242_v7 = vld [vmem:[%s3072_s10 + $0x20] sm:$0xff] }
  0xc4   : > { %769 = vmatpush.bf16.msra.mxu2 %v2242_v7  ;;  %v2284_v9 = vld [vmem:[%s3073_s11 + $0x120] sm:$0xff]  ;;  %v2301_v7 = vld [vmem:[%s3073_s11 + $0x1a8] sm:$0xff] }
  0xc5   : > { %v659_v12 = vpack.c.bf16 %v658_v10, %v658_v10  ;;  %v2283_v10 = vld [vmem:[%s3073_s11 + $0x118] sm:$0xff] }
  0xc7   : > { %1767 = vmatmul.msk.bf16.vlgmr.msra.gmra.mxu1 %vm641_vm8, %v659_v12  ;;  %v2294_v12 = vld [vmem:[%s3073_s11 + $0x170] sm:$0xff] }
  0xc8   : > { %v656_v13 = vpop.f32.mrf.mxu0  ;;  %770 = vmatpush.bf16.msra.mxu2 %v2241_v18  ;;  %1082 = vmatpush.bf16.msra.mxu1 %v2271_v32  ;;  %v2309_v18 = vld [vmem:[%s3073_s11 + $0x1e8] sm:$0xff] }
  0xc9   : > { %v2302_v13 = vld [vmem:[%s3073_s11 + $0x1b0] sm:$0xff]  ;;  %1329 = vmatpush.bf16.msrb.mxu0 %v2294_v12  ;;  %v2297_v32 = vld [vmem:[%s3073_s11 + $0x188] sm:$0xff] }
  0xcc   : > { %771 = vmatpush.bf16.msra.mxu2 %v2240_v23  ;;  %1083 = vmatpush.bf16.msra.mxu1 %v2270_v36  ;;  %v2280_v23 = vld [vmem:[%s3073_s11 + $0x100] sm:$0xff] }
  0xcd   : > { %1330 = vmatpush.bf16.msrb.mxu0 %v2293_v16  ;;  %v2304_v36 = vld [vmem:[%s3073_s11 + $0x1c0] sm:$0xff] }
  0xd0   : > { %772 = vmatpush.bf16.msra.mxu2 %v2239_v24  ;;  %1084 = vmatpush.bf16.msra.mxu1 %v2269_v39  ;;  %v2291_v24 = vld [vmem:[%s3073_s11 + $0x158] sm:$0xff] }
  0xd4   : > { %773 = vmatpush.bf16.msra.mxu2 %v2238_v25  ;;  %1085 = vmatpush.bf16.msra.mxu1 %v2268_v41  ;;  %v2299_v25 = vld [vmem:[%s3073_s11 + $0x198] sm:$0xff]  ;;  %v830_v41 = vpop.f32.mrf.mxu0 }
  0xd7   : > { %1810 = vmatmul.msk.bf16.vlgmr.msrb.gmra.mxu1 %vm641_vm8, %v2683_v17  ;;  %v2252_v17 = vld [vmem:[%s3073_s11 + $0x20] sm:$0xff] }
  0xd8   : > { %1165 = vmatpush.bf16.msrb.mxu2 %v2279_v28  ;;  %919 = vmatpush.bf16.msrb.mxu3 %v2252_v17  ;;  %v2298_v28 = vld [vmem:[%s3073_s11 + $0x190] sm:$0xff]  ;;  %v2319_v17 = vld [vmem:[%s3073_s11 + $0x238] sm:$0xff] }
  0xd9   : > { %1086 = vmatpush.bf16.msra.mxu1 %v2267_v47  ;;  %v2316_v47 = vld [vmem:[%s3073_s11 + $0x220] sm:$0xff] }
  0xdc   : > { %1166 = vmatpush.bf16.msrb.mxu2 %v2278_v33  ;;  %920 = vmatpush.bf16.msrb.mxu3 %v2251_v45  ;;  %v2305_v33 = vld [vmem:[%s3073_s11 + $0x1c8] sm:$0xff]  ;;  %v816_v45 = vpop.f32.mrf.mxu3  ;;  %v832_v46 = vpop.f32.mrf.mxu0 }
  0xdd   : > { %1087 = vmatpush.bf16.msra.mxu1 %v2266_v52  ;;  %v2312_v52 = vld [vmem:[%s3073_s11 + $0x200] sm:$0xff] }
  0xe0   : > { %1167 = vmatpush.bf16.msrb.mxu2 %v2277_v37  ;;  %921 = vmatpush.bf16.msrb.mxu3 %v2250_v50  ;;  %v2314_v50 = vld [vmem:[%s3073_s11 + $0x210] sm:$0xff] }
  0xe1   : > { %1088 = vmatpush.bf16.msra.mxu1 %v2265_v57 }
  0xe4   : > { %1168 = vmatpush.bf16.msrb.mxu2 %v2276_v4  ;;  %922 = vmatpush.bf16.msrb.mxu3 %v2249_v54 }
  0xe5   : > { %1089 = vmatpush.bf16.msra.mxu1 %v2264_v0 }
  0xe8   : > { %1169 = vmatpush.bf16.msrb.mxu2 %v2275_v42  ;;  %923 = vmatpush.bf16.msrb.mxu3 %v2248_v61  ;;  %v2318_v42 = vld [vmem:[%s3073_s11 + $0x230] sm:$0xff] }
  0xe9   : > { %1411 = vmatpush.bf16.msrb.mxu1 %v2303_v2 }
  0xec   : > { %1170 = vmatpush.bf16.msrb.mxu2 %v2274_v49  ;;  %1248 = vmatpush.bf16.msra.mxu3 %v2287_v62  ;;  %v2315_v49 = vld [vmem:[%s3073_s11 + $0x218] sm:$0xff] }
  0xed   : > { %1412 = vmatpush.bf16.msrb.mxu1 %v2302_v13 }
  0xf0   : > { %1171 = vmatpush.bf16.msrb.mxu2 %v2273_v53  ;;  %1249 = vmatpush.bf16.msra.mxu3 %v2286_v6  ;;  %v2394_v53 = vld [vmem:[%s3071_s9] ss:$0 sm:$0xff] }
  0xf1   : > { %1413 = vmatpush.bf16.msrb.mxu1 %v2301_v7  ;;  %v831_v54 = vadd.f32 %v2394_v53, %v830_v41 }
  0xf3   : > { %v834_v57 = vmul.f32 %v831_v54, %v2669_v11 }
  0xf4   : > { %1172 = vmatpush.bf16.msrb.mxu2 %v2272_v58  ;;  %1250 = vmatpush.bf16.msra.mxu3 %v2285_v8 }
  0xf5   : > { %v1096_v62 = vrot.slane %v834_v57, 6  ;;  %v930_v0 = vrot.slane %v834_v57, 4  ;;  %v1179_v2 = vrot.slane %v834_v57, 7 }
  0xf8   : > { %1251 = vmatpush.bf16.msra.mxu3 %v2284_v9 }
  0xfc   : > { %1252 = vmatpush.bf16.msra.mxu3 %v2283_v10 }
 0x100   : > { %1253 = vmatpush.bf16.msra.mxu3 %v2282_v15 }
 0x144   : > { %v692_v20 = vpop.f32.mrf.mxu1 }
 0x145   : > { %v693_v21 = vadd.f32 %v2393_v19, %v692_v20  ;;  %v2281_v19 = vld [vmem:[%s3073_s11 + $0x108] sm:$0xff]  ;;  %v2292_v20 = vld [vmem:[%s3073_s11 + $0x160] sm:$0xff] }
 0x146   : > { %1254 = vmatpush.bf16.msra.mxu3 %v2281_v19  ;;  %1331 = vmatpush.bf16.msrb.mxu0 %v2292_v20 }
 0x147   : > { %696 = vmax.xlane.f32.xlu0 %v693_v21 }
 0x14a   : > { %1255 = vmatpush.bf16.msra.mxu3 %v2280_v23  ;;  %1332 = vmatpush.bf16.msrb.mxu0 %v2291_v24 }
 0x14c   : > { %v694_v22 = vpop.f32.mrf.mxu1 }
 0x14d   : > { %v2308_v22 = vld [vmem:[%s3073_s11 + $0x1e0] sm:$0xff] }
 0x14e   : > { %1333 = vmatpush.bf16.msrb.mxu0 %v2290_v27 }
 0x152   : > { %1334 = vmatpush.bf16.msrb.mxu0 %v2289_v31 }
 0x156   : > { %1335 = vmatpush.bf16.msrb.mxu0 %v2288_v34 }
 0x1ba   : > { %v697_v43 = vpop.xlane.xlu0 %696 }
 0x1bb   : > { %v698_v44 = vsub.f32 %v693_v21, %v697_v43  ;;  %v2300_v21 = vld [vmem:[%s3073_s11 + $0x1a0] sm:$0xff]  ;;  %v847_v43 = vpop.f32.mrf.mxu1 }
 0x1bc   : > { %1414 = vmatpush.bf16.msrb.mxu1 %v2300_v21  ;;  %v848_v55 = vadd.f32 %v2394_v53, %v847_v43 }
 0x1bd   : > { %v699_v48 = vmul.f32 1.442695, %v698_v44  ;;  %v2317_v44 = vld [vmem:[%s3073_s11 + $0x228] sm:$0xff] }
 0x1be   : > { %v851_v58 = vmul.f32 %v848_v55, %v2698_v30 }
 0x1bf   : > { %2395 = vpow2.f32 %v699_v48 }
 0x1c0   : > { %1415 = vmatpush.bf16.msrb.mxu1 %v2299_v25  ;;  %v1342_v10 = vrot.slane %v851_v58, 1  ;;  %v1425_v13 = vrot.slane %v851_v58, 2  ;;  %v1508_v16 = vrot.slane %v851_v58, 3  ;;  %v1590_v7 = vrot.slane %v851_v58, 4 }
 0x1c3   : > { %v849_v48 = vpop.f32.mrf.mxu1 }
 0x1c4   : > { %1416 = vmatpush.bf16.msrb.mxu1 %v2298_v28 }
 0x1c5   : > { %v2856_v56 = vpop.eup %2395 }
 0x1c6   : > { %v701_v59 = vpack.c.bf16 %v2856_v56, %v2856_v56 }
 0x1c8   : > { %774 = vmatmul.bf16.vlgmr.msra.gmra.mxu2 %v701_v59  ;;  %1417 = vmatpush.bf16.msrb.mxu1 %v2297_v32 }
 0x1c9   : > { %1494 = vmatpush.bf16.msra.mxu2 %v2311_v60  ;;  %v1013_v60 = vrot.slane %v834_v57, 5 }
 0x1cc   : > { %1418 = vmatpush.bf16.msrb.mxu1 %v2296_v35 }
 0x1cd   : > { %1495 = vmatpush.bf16.msra.mxu2 %v2310_v14 }
 0x1d1   : > { %1496 = vmatpush.bf16.msra.mxu2 %v2309_v18 }
 0x1d5   : > { %1497 = vmatpush.bf16.msra.mxu2 %v2308_v22 }
 0x1d9   : > { %1498 = vmatpush.bf16.msra.mxu2 %v2307_v26 }
 0x1dd   : > { %1499 = vmatpush.bf16.msra.mxu2 %v2306_v29 }
 0x1e1   : > { %1500 = vmatpush.bf16.msra.mxu2 %v2305_v33 }
 0x1e5   : > { %1501 = vmatpush.bf16.msra.mxu2 %v2304_v36 }
 0x24b   : > { %v775_v37 = vpop.f32.mrf.mxu2 }
 0x24c   : > { %2397 = vrcp.f32 %v775_v37 }
 0x252   : > { %v2398_v38 = vpop.eup %2397 }
 0x253   : > { %v780_v3 = vmul.f32 %v2398_v38, %v2856_v56  ;;  %v777_v39 = vpop.f32.mrf.mxu2  ;;  %v815_v56 = vadd.f32 %v2394_v53, %v814_v40 }
 0x255   : > { %v781_v4 = vpack.c.bf16 %v780_v3, %v780_v3  ;;  %v1012_v59 = vrot.slane %v815_v56, 5  ;;  %v1095_v61 = vrot.slane %v815_v56, 6  ;;  %v929_v63 = vrot.slane %v815_v56, 4 }
 0x256   : > { %v1178_v1 = vrot.slane %v815_v56, 7  ;;  %v1341_v9 = vrot.slane %v815_v56, 1  ;;  %v1424_v12 = vrot.slane %v815_v56, 2  ;;  %v1507_v15 = vrot.slane %v815_v56, 3 }
 0x257   : > { %924 = vmatmul.bf16.vlgmr.msrb.gmra.mxu3 %v781_v4  ;;  %1007 = vmatmul.bf16.vlgmr.msra.gmra.mxu0 %v781_v4  ;;  %v1014_v6 = vsel %vm571_vm1, %v1012_v59, %v1013_v60  ;;  %v1097_v8 = vsel %vm578_vm2, %v1095_v61, %v1096_v62  ;;  %v931_v11 = vsel %vm564_vm0, %v929_v63, %v930_v0 }
 0x258   : > { %1090 = vmatmul.bf16.vlgmr.msra.gmra.mxu1 %v781_v4  ;;  %1173 = vmatmul.bf16.vlgmr.msrb.gmra.mxu2 %v781_v4  ;;  %v1180_v30 = vsel %vm585_vm3, %v1178_v1, %v1179_v2  ;;  %v1343_v14 = vsel %vm595_vm4, %v1341_v9, %v1342_v10  ;;  %v1426_v18 = vsel %vm602_vm5, %v1424_v12, %v1425_v13 }
 0x259   : > { %1577 = vmatpush.bf16.msrb.mxu3 %v2319_v17  ;;  %v1509_v19 = vsel %vm609_vm6, %v1507_v15, %v1508_v16  ;;  %v1591_v20 = vsel %vm615_vm7, %v929_v63, %v1590_v7 }
 0x25d   : > { %1578 = vmatpush.bf16.msrb.mxu3 %v2318_v42 }
 0x261   : > { %1579 = vmatpush.bf16.msrb.mxu3 %v2317_v44 }
 0x265   : > { %1580 = vmatpush.bf16.msrb.mxu3 %v2316_v47 }
 0x267   : > { %1256 = vmatmul.bf16.vlgmr.msra.gmra.mxu3 %v781_v4  ;;  %1336 = vmatmul.bf16.vlgmr.msrb.gmra.mxu0 %v781_v4 }
 0x268   : > { %1419 = vmatmul.bf16.vlgmr.msrb.gmra.mxu1 %v781_v4  ;;  %1502 = vmatmul.bf16.vlgmr.msra.gmra.mxu2 %v781_v4 }
 0x269   : > { %1581 = vmatpush.bf16.msrb.mxu3 %v2315_v49 }
 0x26d   : > { %1582 = vmatpush.bf16.msrb.mxu3 %v2314_v50 }
 0x271   : > { %1583 = vmatpush.bf16.msrb.mxu3 %v2313_v51 }
 0x275   : > { %1584 = vmatpush.bf16.msrb.mxu3 %v2312_v52 }
 0x278   : > { %1585 = vmatmul.bf16.vlgmr.msrb.gmra.mxu3 %v781_v4 }
 0x2d4   : > { %v1008_v21 = vpop.f32.mrf.mxu0 }
 0x2d5   : > { %v1091_v22 = vpop.f32.mrf.mxu1  ;;  %v1015_v24 = vmul.f32 %v1014_v6, %v1008_v21 }
 0x2d6   : > { %v1098_v28 = vmul.f32 %v1097_v8, %v1091_v22 }
 0x2da   : > { %v925_v23 = vpop.f32.mrf.mxu3 }
 0x2db   : > { %v932_v25 = vmul.f32 %v931_v11, %v925_v23  ;;  %v1174_v26 = vpop.f32.mrf.mxu2 }
 0x2dc   : > { %v1010_v27 = vpop.f32.mrf.mxu0  ;;  %v1181_v33 = vmul.f32 %v1180_v30, %v1174_v26 }
 0x2dd   : > { %v1016_v29 = vadd.f32 %v1015_v24, %v932_v25  ;;  %v1093_v31 = vpop.f32.mrf.mxu1 }
 0x2df   : > { %v1099_v32 = vadd.f32 %v1098_v28, %v1016_v29 }
 0x2e1   : > { %v1182_v34 = vadd.f32 %v1181_v33, %v1099_v32 }
 0x2e2   : > { %v927_v35 = vpop.f32.mrf.mxu3 }
 0x2e3   : > { %v1176_v36 = vpop.f32.mrf.mxu2 }
 0x2e4   : > { %v1337_v37 = vpop.f32.mrf.mxu0 }
 0x2e5   : > { %v1420_v5 = vpop.f32.mrf.mxu1  ;;  %v1344_v17 = vmul.f32 %v1343_v14, %v1337_v37 }
 0x2e6   : > { %v1427_v42 = vmul.f32 %v1426_v18, %v1420_v5 }
 0x2ea   : > { %v1257_v38 = vpop.f32.mrf.mxu3 }
 0x2eb   : > { %v1261_v3 = vmul.f32 %v1257_v38, %v815_v56  ;;  %v1503_v39 = vpop.f32.mrf.mxu2 }
 0x2ec   : > { %v1339_v4 = vpop.f32.mrf.mxu0  ;;  %v1510_v45 = vmul.f32 %v1509_v19, %v1503_v39 }
 0x2ed   : > { %v1262_v40 = vadd.f32 %v1261_v3, %v1182_v34  ;;  %v1422_v41 = vpop.f32.mrf.mxu1 }
 0x2ef   : > { %v1345_v43 = vadd.f32 %v1344_v17, %v1262_v40 }
 0x2f1   : > { %v1428_v44 = vadd.f32 %v1427_v42, %v1345_v43 }
 0x2f2   : > { %v1259_v46 = vpop.f32.mrf.mxu3 }
 0x2f3   : > { %v1511_v47 = vadd.f32 %v1510_v45, %v1428_v44  ;;  %v1505_v48 = vpop.f32.mrf.mxu2 }
 0x2fb   : > { %v1586_v49 = vpop.f32.mrf.mxu3 }
 0x2fc   : > { %v1592_v50 = vmul.f32 %v1591_v20, %v1586_v49 }
 0x2fe   : > { %v1593_v51 = vadd.f32 %v1592_v50, %v1511_v47 }
 0x300   : > { %1594 = vst.msk [vmem:[%s504_s30] sm:$0xff] %vm641_vm8, %v1593_v51 }
 0x301   : > { %2426 = shalt.err (!%p2423_p12)
}
 0x302   : > { %2320 = dma.vmem_to_hbm [thread:$0]  (%p2611_p3), %s1611_s19, 128, %s1613_s13, %s1596_s24  }
 0x303   : > { %v1588_v52 = vpop.f32.mrf.mxu3 }
 0x304 PF: > { %s3097_s17 = sld [smem:[#allocation9_spill]] }
 0x305   : > { %s3098_s29 = sld [smem:[#allocation5_spill]] }
 0x30a   : > { %p2326_p13 = scmp.ge.s32.totalorder %s3097_s17, 2 }
 0x30b   : > { %s1624_s20 = sand.u32 1, %s3098_s29  }
 0x30c   : > { %p2323_p0 = pnand %p2326_p13, %p2620_p8  ;;  %s1625_s15 = scalar_lea.sflag [#allocation3], %s1624_s20 }
 0x30e   : > { %p2324_p1 = pneg %p2323_p0 }
 0x310   : > { %2460 = dma.done.wait (%p2324_p1), %s1625_s15, 128  }
 0x311   : > { %2462 = vsyncadd (%p2324_p1), %s1625_s15, 4294967168  ;;  %s25_s28 = sadd.s32 1, %s3097_s17   ;;  %s3100_s18 = sld [smem:[#allocation6_spill]] }
 0x312   : > { %p22_p2 = scmp.ge.s32.totalorder %s25_s28, 6   ;;  %s3101_s23 = sld [smem:[#allocation13_spill]] }
 0x313   : > { %s3102_s24 = sld [smem:[#allocation7_spill]]  ;;  %s3106_s21 = smov %s2469_s22 }
 0x314   : > { %s3103_s25 = sld [smem:[#allocation8_spill]]  ;;  %24 = sbr.rel (!%p22_p2) target bundleno = 7 (0x7), region = 117 }
 0x315   : > { %s3104_s26 = sld [smem:[#allocation10_spill]] }
 0x316   : > { %s3105_s27 = sld [smem:[#allocation11_spill]] }
 0x317   : > { %s3107_s22 = smov %s3100_s18 }
 0x319   :  { %1631 = vsyncpa [#allocation3], 1 }
 0x31a   :  { %1633 = vsyncpa [#allocation3 + $0x1], 1 }

</bundles_post_ra>
